<compile_context>
chip_gen: v6e
topology: v6e:2x2x1
jax: 0.10.0
libtpu: 0.0.40
codegen_flags: <defaults>
</compile_context>

<pallas_src>
import math
import functools

import numpy as np
import jax
import jax.numpy as jnp
from jax.experimental import pallas as pl
from jax.experimental.pallas import tpu as pltpu


def _mha_cls_kernel(
    x_ref,      # (TB*L, D)   data rows for TB batch elements (no class token)
    wvs_ref,    # (D, D+H)    fused [Wv^T | Wk^T @ qm]
    slab_ref,   # (4, P)      rows: [bvs], [s_cls], [v_cls], [b_oc]  (lane-padded)
    oh_ref,     # (H, D)      one-hot head -> feature-column expansion
    pool_ref,   # (TB, TB*L)  block-diagonal pooling matrix (segmented sums)
    woc_ref,    # (D, Cpad)   fused out_proj @ classifier weight, lane-padded
    out_ref,    # (TB, Cpad)  padded logits
    *,
    d_model: int,
    num_heads: int,
    batch_tile: int,
    seq_len: int,
):
    f32 = jnp.float32
    D, H, TB, L = d_model, num_heads, batch_tile, seq_len
    Cp = woc_ref.shape[1]
    wdt = wvs_ref.dtype        # storage dtype of the big weights (f32 or bf16)

    x = x_ref[...]                                                   # (TB*L, D)
    bvs = slab_ref[0:1, : D + H]                                     # (1, D+H)
    s_cls = slab_ref[1:2, :H]                                        # (1, H)
    v_cls = slab_ref[2:3, :D]                                        # (1, D)
    b_oc = slab_ref[3:4, :Cp]                                        # (1, Cpad)

    # Fused V projection + per-head class-token scores: one MXU matmul.
    # Columns [0, D) = V (lane offset 0), columns [D, D+H) = scores.
    vs = jnp.dot(x, wvs_ref[...], preferred_element_type=f32) + bvs  # (TB*L, D+H)
    v = vs[:, :D]                                                    # (TB*L, D)
    s_data = vs[:, D:]                                               # (TB*L, H)

    # Per-batch-element softmax over the S = L+1 keys.  The max is taken per
    # batch element (not per tile), so one element's scores sitting far below
    # another's can no longer underflow its whole softmax group to 0/0.
    s3 = s_data.reshape(TB, L, H)
    m3 = jnp.maximum(jnp.max(s3, axis=1, keepdims=True),
                     s_cls.reshape(1, 1, H))                          # (TB, 1, H)
    e_data = jnp.exp(s3 - m3).reshape(TB * L, H)                      # (TB*L, H)
    m_b = m3.reshape(TB, H)                                           # (TB, H)
    e_cls = jnp.exp(s_cls - m_b)                                      # (TB, H)

    pool = pool_ref[...]                                              # (TB, TB*L)
    denom = jnp.dot(pool, e_data.astype(pool.dtype),
                    preferred_element_type=f32) + e_cls               # (TB, H)
    # EUP reciprocal on the (TB, H) tensor before expansion (D/H fewer divides).
    inv = pl.reciprocal(denom, approx=False)                          # (TB, H)

    oh = oh_ref[...]                                                  # (H, D)
    e_data_x = jnp.dot(e_data.astype(oh.dtype), oh,
                       preferred_element_type=f32)                    # (TB*L, D)
    e_cls_x = jnp.dot(e_cls.astype(oh.dtype), oh,
                      preferred_element_type=f32)                     # (TB, D)
    inv_x = jnp.dot(inv.astype(oh.dtype), oh,
                    preferred_element_type=f32)                       # (TB, D)

    num = (jnp.dot(pool, (e_data_x * v).astype(pool.dtype),
                   preferred_element_type=f32)
           + e_cls_x * v_cls)                                         # (TB, D)
    attn = num * inv_x                                                # (TB, D)

    # Fused out_proj -> classifier: one (TB, D) @ (D, Cpad) matmul.
    logits = jnp.dot(attn.astype(wdt), woc_ref[...],
                     preferred_element_type=f32) + b_oc               # (TB, Cpad)
    out_ref[...] = logits.astype(out_ref.dtype)


def prepare_kernel_params(params, *, num_heads, lane_pad=128,
                          compute_dtype=jnp.float32):
    """One-time preprocessing of PyTorch-layout parameters for the kernel."""
    f32 = jnp.float32
    g = lambda k: jnp.asarray(params[k], f32)
    q_w, q_b = g("q_w"), g("q_b")
    k_w, k_b = g("k_w"), g("k_b")
    v_w, v_b = g("v_w"), g("v_b")
    out_w, out_b = g("out_w"), g("out_b")
    cls_w, cls_b = g("classifier_w"), g("classifier_b")

    D = q_w.shape[0]
    H = num_heads
    assert D % H == 0, "d_model must be divisible by num_heads"
    hd = D // H
    cls_tok = g("class_token").reshape(1, D)

    # Class-token rows (Linear: x @ W^T + b).
    q_cls = cls_tok @ q_w.T + q_b[None, :]                 # (1, D)
    k_cls = cls_tok @ k_w.T + k_b[None, :]                 # (1, D)
    v_cls = cls_tok @ v_w.T + v_b[None, :]                 # (1, D)

    # Per-head-masked, pre-scaled class-token query (D, H).
    head_id = jnp.arange(D) // hd
    onehot_T = (head_id[None, :] == jnp.arange(H)[:, None]).astype(f32)  # (H, D)
    qm = onehot_T.T * (q_cls[0] / math.sqrt(hd))[:, None]                # (D, H)

    # Fold the K projection into the score weights:
    #   s = k @ qm = x @ (Wk^T @ qm) + bk @ qm ;  s_cls = k_cls @ qm.
    ws = k_w.T @ qm                                        # (D, H)
    bs = k_b @ qm                                          # (H,)
    s_cls = k_cls @ qm                                     # (1, H)

    # Fused projection, V first so the wide slice starts at lane offset 0.
    wvs = jnp.concatenate([v_w.T, ws], axis=1)             # (D, D+H)
    bvs = jnp.concatenate([v_b, bs])                       # (D+H,)

    # Fuse out_proj -> classifier (no nonlinearity between them).
    C = cls_b.shape[0]
    c_pad = -(-C // lane_pad) * lane_pad
    w_oc = out_w.T @ cls_w.T                               # (D, C)
    b_oc = out_b @ cls_w.T + cls_b                         # (C,)
    w_oc_pad = jnp.zeros((D, c_pad), f32).at[:, :C].set(w_oc)

    # Consolidate all tiny (1, .) operands into one lane-padded slab (kept f32).
    P = -(-max(D + H, c_pad) // lane_pad) * lane_pad
    slab = jnp.zeros((4, P), f32)
    slab = slab.at[0, : D + H].set(bvs)
    slab = slab.at[1, :H].set(s_cls[0])
    slab = slab.at[2, :D].set(v_cls[0])
    slab = slab.at[3, :C].set(b_oc)

    cd = compute_dtype
    return dict(
        d_model=D, num_heads=H, num_classes=C, c_pad=c_pad, dtype=cd,
        wvs=wvs.astype(cd), slab=slab, oh=onehot_T.astype(cd),
        w_oc=w_oc_pad.astype(cd),
    )


def _num_tensorcores():
    """Best-effort TensorCore count per device (v7x megacore = 2, v5e/v6e = 1)."""
    try:
        d = jax.devices()[0]
        return max(1, int(getattr(d, "num_cores", 1)))
    except Exception:
        return 1


@functools.lru_cache(maxsize=8)
def _pool_matrix(batch_tile, seq_len, dtype_name):
    """Block-diagonal pooling matrix: local row r belongs to batch r // L."""
    rows = np.arange(batch_tile * seq_len) // seq_len
    pool = (rows[None, :] == np.arange(batch_tile)[:, None]).astype(np.float32)
    return jnp.asarray(pool, dtype=jnp.dtype(dtype_name))


def _pick_batch_tile(B, L, *, num_tensorcores=1, min_rows=256, max_rows=2048):
    """Choose TB (a divisor of B).  Preferences, in order:
       1. TB*L <= max_rows     (bounded VMEM / pipeline granularity),
       2. TB*L >= min_rows     (fill the 256-deep MXU M dim on v6e/v7x),
       3. grid >= num TCs while keeping (2)   (v7x megacore),
       4. largest TB           (fewest ~600-cycle grid steps; on single-TC
                                v5e/v6e this collapses to grid=1).
       TB is a multiple of 8 (or B itself) so all block shapes stay aligned."""
    cands = [t for t in range(1, B + 1) if B % t == 0 and (t == B or t % 8 == 0)]
    fitting = [t for t in cands if t * L <= max_rows]
    if not fitting:
        return min(cands)
    return max(fitting, key=lambda t: (t * L >= min_rows,
                                       (B // t) >= num_tensorcores
                                       and t * L >= min_rows,
                                       t))


def mha_classifier_forward(x, kparams, *, batch_tile=None, num_tensorcores=None,
                           single_buffer_weights=False, vmem_limit_bytes=None):
    """Forward pass matching MultiHeadAttentionClassifier.forward.

    x: (B, L, D).  kparams: output of prepare_kernel_params.
    Returns logits of shape (B, num_classes).
    """
    B, L, D = x.shape
    assert D == kparams["d_model"]
    H = kparams["num_heads"]
    C, c_pad = kparams["num_classes"], kparams["c_pad"]
    cd = kparams["dtype"]

    if num_tensorcores is None:
        num_tensorcores = _num_tensorcores()
    TB = batch_tile if batch_tile is not None else _pick_batch_tile(
        B, L, num_tensorcores=num_tensorcores)
    assert B % TB == 0 and (TB == B or TB % 8 == 0), "bad batch tile"

    # (B, L, D) -> (B*L, D): contiguous view, no class-token concat in HBM.
    x2d = jnp.asarray(x).astype(cd).reshape(B * L, D)
    pool = _pool_matrix(TB, L, jnp.dtype(cd).name)

    def wspec(a):
        # Grid-invariant blocks (constant index_map): DMA'd once.
        if single_buffer_weights:
            # For v7x (64 MiB VMEM) at large d_model: the blocks never change,
            # so single-buffering halves their VMEM footprint at zero cost.
            return pl.BlockSpec(a.shape, lambda i: (0, 0),
                                pipeline_mode=pl.Buffered(1))
        return pl.BlockSpec(a.shape, lambda i: (0, 0))

    # Raise scoped VMEM automatically for big d_model (v5e defaults to 16 MiB).
    if vmem_limit_bytes is None:
        itemsize = jnp.dtype(cd).itemsize
        weight_bytes = ((kparams["wvs"].size + kparams["w_oc"].size
                         + kparams["oh"].size + pool.size) * itemsize
                        + kparams["slab"].size * 4)
        block_bytes = 2 * (TB * L * D * itemsize + TB * c_pad * 4)
        est = ((1 if single_buffer_weights else 2) * weight_bytes
               + block_bytes + (2 << 20))
        if est > (16 << 20):
            vmem_limit_bytes = min(est, 64 << 20)

    kernel = functools.partial(_mha_cls_kernel, d_model=D, num_heads=H,
                               batch_tile=TB, seq_len=L)

    logits_pad = pl.pallas_call(
        kernel,
        out_shape=jax.ShapeDtypeStruct((B, c_pad), jnp.float32),
        grid_spec=pltpu.PrefetchScalarGridSpec(
            num_scalar_prefetch=0,
            grid=(B // TB,),
            in_specs=[
                pl.BlockSpec((TB * L, D), lambda i: (i, 0)),   # x rows
                wspec(kparams["wvs"]),
                wspec(kparams["slab"]),
                wspec(kparams["oh"]),
                wspec(pool),
                wspec(kparams["w_oc"]),
            ],
            out_specs=pl.BlockSpec((TB, c_pad), lambda i: (i, 0)),
        ),
        compiler_params=pltpu.CompilerParams(
            dimension_semantics=("parallel",),
            vmem_limit_bytes=vmem_limit_bytes,
        ),
    )(x2d, kparams["wvs"], kparams["slab"], kparams["oh"], pool, kparams["w_oc"])

    return logits_pad[:, :C]                                   # (B, C)


def _reference_forward(x, params, *, num_heads):
    """Pure-JAX reference mirroring the PyTorch forward (for validation)."""
    B, L, D = x.shape
    hd = D // num_heads
    cls_tok = jnp.broadcast_to(params["class_token"], (B, 1, D))
    xc = jnp.concatenate([cls_tok, x], axis=1)                 # (B, S, D)

    def lin(z, w, b):
        return jnp.einsum("bsd,od->bso", z, w) + b

    q = lin(xc, params["q_w"], params["q_b"])
    k = lin(xc, params["k_w"], params["k_b"])
    v = lin(xc, params["v_w"], params["v_b"])

    def split(z):  # (B, S, D) -> (B, H, S, hd)
        return z.reshape(B, -1, num_heads, hd).transpose(0, 2, 1, 3)

    q, k, v = split(q), split(k), split(v)
    scores = jnp.einsum("bhqd,bhkd->bhqk", q, k) / math.sqrt(hd)
    probs = jax.nn.softmax(scores, axis=-1)
    attn = jnp.einsum("bhqk,bhkd->bhqd", probs, v)
    attn = attn.transpose(0, 2, 1, 3).reshape(B, -1, D)
    out = lin(attn, params["out_w"], params["out_b"])
    cls_out = out[:, 0]
    return cls_out @ params["classifier_w"].T + params["classifier_b"]


def make_params(key, d_model, num_classes):
    ks = jax.random.split(key, 11)
    n = lambda k, shape, s=0.02: s * jax.random.normal(k, shape, dtype=jnp.float32)
    return {
        "q_w": n(ks[0], (d_model, d_model)),
        "q_b": n(ks[1], (d_model,)),
        "k_w": n(ks[2], (d_model, d_model)),
        "k_b": n(ks[3], (d_model,)),
        "v_w": n(ks[4], (d_model, d_model)),
        "v_b": n(ks[5], (d_model,)),
        "out_w": n(ks[6], (d_model, d_model)),
        "out_b": n(ks[7], (d_model,)),
        "class_token": jax.random.normal(ks[8], (1, 1, d_model), dtype=jnp.float32),
        "classifier_w": n(ks[9], (num_classes, d_model)),
        "classifier_b": n(ks[10], (num_classes,)),
    }


if __name__ == "__main__":
    # Small, forward-consistent shapes: d_model=32, num_heads=4 (head_dim=8),
    # length_max=16 (S=17 with class token), batch=16, num_classes=2.
    # The tile heuristic resolves to TB=16 -> 256 rows in a single grid step.
    batch = 16
    length_max = 16
    d_model = 32
    num_heads = 4
    num_classes = 2

    key = jax.random.PRNGKey(0)
    k_params, k_x = jax.random.split(key)
    params = make_params(k_params, d_model, num_classes)
    x = jax.random.normal(k_x, (batch, length_max, d_model), dtype=jnp.float32)

    kparams = prepare_kernel_params(params, num_heads=num_heads)
    logits = mha_classifier_forward(x, kparams)
    logits = jax.block_until_ready(logits)

    ref = _reference_forward(x, params, num_heads=num_heads)
    assert logits.shape == (batch, num_classes)
    assert jnp.allclose(logits, ref, atol=2e-5, rtol=2e-5), (logits, ref)

    print("KERNEL_OK")
</pallas_src>

<mosaic_0001>
module attributes {stable_mosaic.version = 11 : i64} {
  func.func @_mha_cls_kernel(%arg0: i32, %arg1: memref<256x32xf32, #tpu.memory_space<vmem>>, %arg2: memref<32x36xf32, #tpu.memory_space<vmem>>, %arg3: memref<4x128xf32, #tpu.memory_space<vmem>>, %arg4: memref<4x32xf32, #tpu.memory_space<vmem>>, %arg5: memref<16x256xf32, #tpu.memory_space<vmem>>, %arg6: memref<32x128xf32, #tpu.memory_space<vmem>>, %arg7: memref<16x128xf32, #tpu.memory_space<vmem>>) attributes {dimension_semantics = [#tpu.dimension_semantics<parallel>], iteration_bounds = array<i64: 1>, scalar_prefetch = 0 : i64, scratch_operands = 0 : i64, tpu.core_type = #tpu.core_type<tc>, window_params = [{transform_indices = @transform_0, window_bounds = array<i64: 256, 32>}, {pipeline_mode = #tpu.pipeline_mode<synchronous>, transform_indices = @transform_1, window_bounds = array<i64: 32, 36>}, {pipeline_mode = #tpu.pipeline_mode<synchronous>, transform_indices = @transform_2, window_bounds = array<i64: 4, 128>}, {pipeline_mode = #tpu.pipeline_mode<synchronous>, transform_indices = @transform_3, window_bounds = array<i64: 4, 32>}, {pipeline_mode = #tpu.pipeline_mode<synchronous>, transform_indices = @transform_4, window_bounds = array<i64: 16, 256>}, {pipeline_mode = #tpu.pipeline_mode<synchronous>, transform_indices = @transform_5, window_bounds = array<i64: 32, 128>}, {transform_indices = @transform_6, window_bounds = array<i64: 16, 128>}]} {
    %c0 = arith.constant 0 : index
    %c0_0 = arith.constant 0 : index
    %0 = vector.load %arg1[%c0, %c0_0] : memref<256x32xf32, #tpu.memory_space<vmem>>, vector<256x32xf32>
    %c0_1 = arith.constant 0 : index
    %c0_2 = arith.constant 0 : index
    %1 = vector.load %arg3[%c0_1, %c0_2] : memref<4x128xf32, #tpu.memory_space<vmem>>, vector<1x36xf32>
    %c1 = arith.constant 1 : index
    %c0_3 = arith.constant 0 : index
    %2 = vector.load %arg3[%c1, %c0_3] : memref<4x128xf32, #tpu.memory_space<vmem>>, vector<1x4xf32>
    %c2 = arith.constant 2 : index
    %c0_4 = arith.constant 0 : index
    %3 = vector.load %arg3[%c2, %c0_4] : memref<4x128xf32, #tpu.memory_space<vmem>>, vector<1x32xf32>
    %c3 = arith.constant 3 : index
    %c0_5 = arith.constant 0 : index
    %4 = vector.load %arg3[%c3, %c0_5] : memref<4x128xf32, #tpu.memory_space<vmem>>, vector<1x128xf32>
    %c0_6 = arith.constant 0 : index
    %c0_7 = arith.constant 0 : index
    %5 = vector.load %arg2[%c0_6, %c0_7] : memref<32x36xf32, #tpu.memory_space<vmem>>, vector<32x36xf32>
    %cst = arith.constant dense<0.000000e+00> : vector<256x36xf32>
    %6 = tpu.matmul %0, %5, %cst {dimension_numbers = #tpu.dot_dimension_numbers<[1], [0], [0], [1], [0, 0, 1, 1], [], []>} : vector<256x32xf32>, vector<32x36xf32>, vector<256x36xf32> -> vector<256x36xf32>
    %7 = vector.broadcast %1 : vector<1x36xf32> to vector<256x36xf32>
    %8 = arith.addf %6, %7 : vector<256x36xf32>
    %9 = vector.extract_strided_slice %8 {offsets = [0, 0], sizes = [256, 32], strides = [1, 1]} : vector<256x36xf32> to vector<256x32xf32>
    %10 = vector.extract_strided_slice %8 {offsets = [0, 32], sizes = [256, 4], strides = [1, 1]} : vector<256x36xf32> to vector<256x4xf32>
    %11 = vector.shape_cast %10 : vector<256x4xf32> to vector<16x16x4xf32>
    %cst_8 = arith.constant dense<0xFF800000> : vector<16x4xf32>
    %12 = vector.multi_reduction <maximumf>, %11, %cst_8 [1] : vector<16x16x4xf32> to vector<16x4xf32>
    %13 = vector.shape_cast %12 : vector<16x4xf32> to vector<16x1x4xf32>
    %14 = vector.shape_cast %2 : vector<1x4xf32> to vector<1x1x4xf32>
    %15 = vector.broadcast %14 : vector<1x1x4xf32> to vector<16x1x4xf32>
    %16 = arith.maximumf %13, %15 : vector<16x1x4xf32>
    %17 = vector.broadcast %16 : vector<16x1x4xf32> to vector<16x16x4xf32>
    %18 = arith.subf %11, %17 : vector<16x16x4xf32>
    %19 = math.exp %18 : vector<16x16x4xf32>
    %20 = vector.shape_cast %19 : vector<16x16x4xf32> to vector<256x4xf32>
    %21 = vector.shape_cast %16 : vector<16x1x4xf32> to vector<16x4xf32>
    %22 = vector.broadcast %2 : vector<1x4xf32> to vector<16x4xf32>
    %23 = arith.subf %22, %21 : vector<16x4xf32>
    %24 = math.exp %23 : vector<16x4xf32>
    %c0_9 = arith.constant 0 : index
    %c0_10 = arith.constant 0 : index
    %25 = vector.load %arg5[%c0_9, %c0_10] : memref<16x256xf32, #tpu.memory_space<vmem>>, vector<16x256xf32>
    %cst_11 = arith.constant dense<0.000000e+00> : vector<16x4xf32>
    %26 = tpu.matmul %25, %20, %cst_11 {dimension_numbers = #tpu.dot_dimension_numbers<[1], [0], [0], [1], [0, 0, 1, 1], [], []>} : vector<16x256xf32>, vector<256x4xf32>, vector<16x4xf32> -> vector<16x4xf32>
    %27 = arith.addf %26, %24 : vector<16x4xf32>
    %28 = tpu.reciprocal %27 : vector<16x4xf32> -> vector<16x4xf32>
    %c0_12 = arith.constant 0 : index
    %c0_13 = arith.constant 0 : index
    %29 = vector.load %arg4[%c0_12, %c0_13] : memref<4x32xf32, #tpu.memory_space<vmem>>, vector<4x32xf32>
    %cst_14 = arith.constant dense<0.000000e+00> : vector<256x32xf32>
    %30 = tpu.matmul %20, %29, %cst_14 {dimension_numbers = #tpu.dot_dimension_numbers<[1], [0], [0], [1], [0, 0, 1, 1], [], []>} : vector<256x4xf32>, vector<4x32xf32>, vector<256x32xf32> -> vector<256x32xf32>
    %cst_15 = arith.constant dense<0.000000e+00> : vector<16x32xf32>
    %31 = tpu.matmul %24, %29, %cst_15 {dimension_numbers = #tpu.dot_dimension_numbers<[1], [0], [0], [1], [0, 0, 1, 1], [], []>} : vector<16x4xf32>, vector<4x32xf32>, vector<16x32xf32> -> vector<16x32xf32>
    %cst_16 = arith.constant dense<0.000000e+00> : vector<16x32xf32>
    %32 = tpu.matmul %28, %29, %cst_16 {dimension_numbers = #tpu.dot_dimension_numbers<[1], [0], [0], [1], [0, 0, 1, 1], [], []>} : vector<16x4xf32>, vector<4x32xf32>, vector<16x32xf32> -> vector<16x32xf32>
    %33 = arith.mulf %30, %9 : vector<256x32xf32>
    %cst_17 = arith.constant dense<0.000000e+00> : vector<16x32xf32>
    %34 = tpu.matmul %25, %33, %cst_17 {dimension_numbers = #tpu.dot_dimension_numbers<[1], [0], [0], [1], [0, 0, 1, 1], [], []>} : vector<16x256xf32>, vector<256x32xf32>, vector<16x32xf32> -> vector<16x32xf32>
    %35 = vector.broadcast %3 : vector<1x32xf32> to vector<16x32xf32>
    %36 = arith.mulf %31, %35 : vector<16x32xf32>
    %37 = arith.addf %34, %36 : vector<16x32xf32>
    %38 = arith.mulf %37, %32 : vector<16x32xf32>
    %c0_18 = arith.constant 0 : index
    %c0_19 = arith.constant 0 : index
    %39 = vector.load %arg6[%c0_18, %c0_19] : memref<32x128xf32, #tpu.memory_space<vmem>>, vector<32x128xf32>
    %cst_20 = arith.constant dense<0.000000e+00> : vector<16x128xf32>
    %40 = tpu.matmul %38, %39, %cst_20 {dimension_numbers = #tpu.dot_dimension_numbers<[1], [0], [0], [1], [0, 0, 1, 1], [], []>} : vector<16x32xf32>, vector<32x128xf32>, vector<16x128xf32> -> vector<16x128xf32>
    %41 = vector.broadcast %4 : vector<1x128xf32> to vector<16x128xf32>
    %42 = arith.addf %40, %41 : vector<16x128xf32>
    %c0_21 = arith.constant 0 : index
    %c0_22 = arith.constant 0 : index
    %43 = vector.load %arg7[%c0_21, %c0_22] : memref<16x128xf32, #tpu.memory_space<vmem>>, vector<16x128xf32>
    tpu.vector_store %arg7[%c0_21, %c0_22], %42 {strides = array<i32>} : memref<16x128xf32, #tpu.memory_space<vmem>>, vector<16x128xf32>,
    return
  }
  func.func @transform_0(%arg0: i32) -> (i32, i32) {
    %c0_i32 = arith.constant 0 : i32
    %c0_i32_0 = arith.constant 0 : i32
    return %arg0, %c0_i32 : i32, i32
  }
  func.func @transform_1(%arg0: i32) -> (i32, i32) {
    %c0_i32 = arith.constant 0 : i32
    %c0_i32_0 = arith.constant 0 : i32
    %c0_i32_1 = arith.constant 0 : i32
    return %c0_i32, %c0_i32_0 : i32, i32
  }
  func.func @transform_2(%arg0: i32) -> (i32, i32) {
    %c0_i32 = arith.constant 0 : i32
    %c0_i32_0 = arith.constant 0 : i32
    %c0_i32_1 = arith.constant 0 : i32
    return %c0_i32, %c0_i32_0 : i32, i32
  }
  func.func @transform_3(%arg0: i32) -> (i32, i32) {
    %c0_i32 = arith.constant 0 : i32
    %c0_i32_0 = arith.constant 0 : i32
    %c0_i32_1 = arith.constant 0 : i32
    return %c0_i32, %c0_i32_0 : i32, i32
  }
  func.func @transform_4(%arg0: i32) -> (i32, i32) {
    %c0_i32 = arith.constant 0 : i32
    %c0_i32_0 = arith.constant 0 : i32
    %c0_i32_1 = arith.constant 0 : i32
    return %c0_i32, %c0_i32_0 : i32, i32
  }
  func.func @transform_5(%arg0: i32) -> (i32, i32) {
    %c0_i32 = arith.constant 0 : i32
    %c0_i32_0 = arith.constant 0 : i32
    %c0_i32_1 = arith.constant 0 : i32
    return %c0_i32, %c0_i32_0 : i32, i32
  }
  func.func @transform_6(%arg0: i32) -> (i32, i32) {
    %c0_i32 = arith.constant 0 : i32
    %c0_i32_0 = arith.constant 0 : i32
    return %arg0, %c0_i32 : i32, i32
  }
}

</mosaic_0001>

<bundles_post_ra>
// kernel: tpu_custom_call.1
= control target key start
LH: loop header
LB: loop body
LE: loop exit
PB: predicated region body
PF: predicated region fallthrough
CT: control target
= control target key end

     0   :  { %vm68_vm0 = vcmask 261120   ;;  %s2901_s0 = inlined_call_operand.vmem [shape: f32[256,32], index: 0, kind: input, shape index: {}]   ;;  %s2902_s1 = inlined_call_operand.vmem [shape: f32[32,36], index: 1, kind: input, shape index: {}]   ;;  %s2903_s2 = inlined_call_operand.vmem [shape: f32[4,128], index: 2, kind: input, shape index: {}]   ;;  %s2904_s3 = inlined_call_operand.vmem [shape: f32[4,32], index: 3, kind: input, shape index: {}]   ;;  %s2905_s4 = inlined_call_operand.vmem [shape: f32[16,256], index: 4, kind: input, shape index: {}]   ;;  %s2906_s5 = inlined_call_operand.vmem [shape: f32[32,128], index: 5, kind: input, shape index: {}]   ;;  %s2907_s6 = inlined_call_operand.hbm [shape: f32[16,128], index: 6, kind: output, shape index: {}]  }
   0x1   :  { %v63_v0 = vld [vmem:[%s2902_s1 + $0x18] sm:$0xff]  ;;  %v62_v1 = vld [vmem:[%s2902_s1 + $0x10] sm:$0xff]  ;;  %v61_v2 = vld [vmem:[%s2902_s1 + $0x8] sm:$0xff] }
   0x2   :  { %1903 = vmatprep.subr.mxu0 %v63_v0  ;;  %2030 = vmatprep.subr.mxu1 %v63_v0  ;;  %v60_v3 = vld [vmem:[%s2902_s1] sm:$0xff]  ;;  %v25_v6 = vld [vmem:[%s2901_s0 + $0x8] sm:$0xff]  ;;  %v26_v8 = vld [vmem:[%s2901_s0 + $0x10] sm:$0xff] }
   0x3   :  { %1904 = vmatpush3.msra.mxu0 %v63_v0  ;;  %2034 = vmatpush3.msra.mxu1 %v63_v0  ;;  %v24_v4 = vld [vmem:[%s2901_s0] sm:$0xff]  ;;  %v53_v7 = vld [vmem:[%s2901_s0 + $0xe8] sm:$0xff]  ;;  %v54_v9 = vld [vmem:[%s2901_s0 + $0xf0] sm:$0xff] }
   0x4   :  { %1905 = vmatprep.subr.mxu0 %v62_v1  ;;  %2031 = vmatprep.subr.mxu1 %v62_v1  ;;  %v52_v5 = vld [vmem:[%s2901_s0 + $0xe0] sm:$0xff]  ;;  %v27_v10 = vld [vmem:[%s2901_s0 + $0x18] sm:$0xff] }
   0x5   :  { %1906 = vmatpush3.msra.mxu0 %v62_v1  ;;  %2035 = vmatpush3.msra.mxu1 %v62_v1  ;;  %v55_v11 = vld [vmem:[%s2901_s0 + $0xf8] sm:$0xff]  ;;  %v28_v12 = vld [vmem:[%s2901_s0 + $0x20] sm:$0xff] }
   0x6   :  { %1907 = vmatprep.subr.mxu0 %v61_v2  ;;  %2032 = vmatprep.subr.mxu1 %v61_v2  ;;  %v57_v13 = vld [vmem:[%s2903_s2 + $0x1] sm:$0x1] }
   0x7   :  { %1908 = vmatpush3.msra.mxu0 %v61_v2  ;;  %2036 = vmatpush3.msra.mxu1 %v61_v2 }
   0x8   :  { %1909 = vmatprep.subr.mxu0 %v60_v3  ;;  %2033 = vmatprep.subr.mxu1 %v60_v3 }
   0x9   :  { %1910 = vmatpush3.msra.mxu0 %v60_v3  ;;  %2037 = vmatpush3.msra.mxu1 %v60_v3 }
   0xa   :  { %1911 = vmatprep.mubr.msk.f32.mxu0 %vm68_vm0, %v24_v4  ;;  %1953 = vmatprep.mubr.msk.f32.mxu1 %vm68_vm0, %v52_v5 }
   0xb   :  { %1912 = vmatmul.mubr.msk.f32.vlgmr.msra.gmra.mxu0 %vm68_vm0, %v25_v6  ;;  %1954 = vmatmul.mubr.msk.f32.vlgmr.msra.gmra.mxu1 %vm68_vm0, %v53_v7 }
   0xc   :  { %1914 = vmatprep.mubr.msk.f32.mxu0 %vm68_vm0, %v26_v8  ;;  %1956 = vmatprep.mubr.msk.f32.mxu1 %vm68_vm0, %v54_v9 }
   0xd   :  { %11 = vsyncpa [#allocation3], 0  ;;  %s2140_s24 = smov 32   ;;  %v29_v14 = vld [vmem:[%s2901_s0 + $0x28] sm:$0xff]  ;;  %v30_v15 = vld [vmem:[%s2901_s0 + $0x30] sm:$0xff]  ;;  %vm390_vm1 = vcmask 294144   ;;  %v555_v0 = vlaneseq }
   0xe   :  { %536 = vrot.lane.b32.xlu0 %v57_v13, %s2140_s24  ;;  %v31_v16 = vld [vmem:[%s2901_s0 + $0x38] sm:$0xff]  ;;  %v32_v17 = vld [vmem:[%s2901_s0 + $0x40] sm:$0xff]  ;;  %v33_v18 = vld [vmem:[%s2901_s0 + $0x48] sm:$0xff]  ;;  %vm1057_vm2 = vcmask 1043456   ;;  %s2141_s24 = smov 96   ;;  %vm736_vm3 = vcmask 1041409  }
   0xf   :  { %1915 = vmatmul.mubr.msk.f32.gmra.mxu0 %vm68_vm0, %v27_v10  ;;  %1957 = vmatmul.mubr.msk.f32.gmra.mxu1 %vm68_vm0, %v55_v11  ;;  %v34_v19 = vld [vmem:[%s2901_s0 + $0x50] sm:$0xff]  ;;  %v35_v20 = vld [vmem:[%s2901_s0 + $0x58] sm:$0xff]  ;;  %v36_v21 = vld [vmem:[%s2901_s0 + $0x60] sm:$0xff]  ;;  %v556_v13 = vshrl.u32 %v555_v0, 7  ;;  %vm739_vm4 = vcmask 1042434   ;;  %vm742_vm5 = vcmask 1043459  }
  0x10   :  { %1917 = vmatprep.mubr.msk.f32.mxu0 %vm68_vm0, %v28_v12  ;;  %v37_v22 = vld [vmem:[%s2901_s0 + $0x68] sm:$0xff]  ;;  %v38_v23 = vld [vmem:[%s2901_s0 + $0x70] sm:$0xff]  ;;  %v39_v24 = vld [vmem:[%s2901_s0 + $0x78] sm:$0xff]  ;;  %vm745_vm6 = vcmask 1044484   ;;  %vm748_vm7 = vcmask 1045509   ;;  %vm751_vm8 = vcmask 1046534  }
  0x11   :  { %v40_v25 = vld [vmem:[%s2901_s0 + $0x80] sm:$0xff]  ;;  %v41_v26 = vld [vmem:[%s2901_s0 + $0x88] sm:$0xff]  ;;  %v42_v27 = vld [vmem:[%s2901_s0 + $0x90] sm:$0xff]  ;;  %vm754_vm9 = vcmask 1047559   ;;  %vm992_vm10 = vcmask 31744   ;;  %s2142_s21 = smov [#allocation2]  }
  0x12   :  { %v43_v28 = vld [vmem:[%s2901_s0 + $0x98] sm:$0xff]  ;;  %v44_v29 = vld [vmem:[%s2901_s0 + $0xa0] sm:$0xff]  ;;  %v45_v30 = vld [vmem:[%s2901_s0 + $0xa8] sm:$0xff]  ;;  %s1659_s22 = sshll.u32 %s2142_s21, 4  ;;  %s1660_s22 = int_to_ptr.vmem [resolvable:$true] %s1659_s22 }
  0x13   :  { %1918 = vmatmul.mubr.msk.f32.gmra.mxu0 %vm68_vm0, %v29_v14  ;;  %v46_v31 = vld [vmem:[%s2901_s0 + $0xb0] sm:$0xff]  ;;  %v47_v32 = vld [vmem:[%s2901_s0 + $0xb8] sm:$0xff]  ;;  %v48_v33 = vld [vmem:[%s2901_s0 + $0xc0] sm:$0xff]  ;;  %p2123_p1 = scmp.lt.s32.totalorder %s1660_s22, %s1660_s22 }
  0x14   :  { %1920 = vmatprep.mubr.msk.f32.mxu0 %vm68_vm0, %v30_v15  ;;  %v49_v34 = vld [vmem:[%s2901_s0 + $0xc8] sm:$0xff]  ;;  %v50_v35 = vld [vmem:[%s2901_s0 + $0xd0] sm:$0xff]  ;;  %v51_v36 = vld [vmem:[%s2901_s0 + $0xd8] sm:$0xff]  ;;  %s2118_s0 = scalar_lea.vmem %s1660_s22, 256 }
  0x15   :  { %v2326_v37 = vld [vmem:[%s2903_s2] ss:$0 sm:$0xff]  ;;  %p2119_p0 = scmp.ne.s32.totalorder %s1660_s22, %s2118_s0  ;;  %p2124_p2 = scmp.lt.s32.totalorder %s2118_s0, %s2118_s0 }
  0x16   :  { %v991_v11 = vld [vmem:[%s2904_s3] sm:$0xf] }
  0x17   :  { %1921 = vmatmul.mubr.msk.f32.gmra.mxu0 %vm68_vm0, %v31_v16  ;;  %1959 = vmatprep.subr.msk.mxu1 %vm1057_vm2, %v991_v11  ;;  %p2125_p3 = por %p2124_p2, %p2123_p1 }
  0x18   :  { %1923 = vmatprep.mubr.msk.f32.mxu0 %vm68_vm0, %v32_v17  ;;  %1960 = vmatpush3.msk.msra.mxu1 %vm1057_vm2, %v991_v11 }
  0x19   :  { %p2126_p4 = pnand %p2125_p3, %p2119_p0 }
  0x1b   :  { %1924 = vmatmul.mubr.msk.f32.gmra.mxu0 %vm68_vm0, %v33_v18 }
  0x1c   :  { %1926 = vmatprep.mubr.msk.f32.mxu0 %vm68_vm0, %v34_v19 }
  0x1f   :  { %1927 = vmatmul.mubr.msk.f32.gmra.mxu0 %vm68_vm0, %v35_v20 }
  0x20   :  { %1929 = vmatprep.mubr.msk.f32.mxu0 %vm68_vm0, %v36_v21 }
  0x23   :  { %1930 = vmatmul.mubr.msk.f32.gmra.mxu0 %vm68_vm0, %v37_v22 }
  0x24   :  { %1932 = vmatprep.mubr.msk.f32.mxu0 %vm68_vm0, %v38_v23 }
  0x27   :  { %1933 = vmatmul.mubr.msk.f32.gmra.mxu0 %vm68_vm0, %v39_v24 }
  0x28   :  { %1935 = vmatprep.mubr.msk.f32.mxu0 %vm68_vm0, %v40_v25  ;;  %v2381_v25 = vsub.s32 0, %v556_v13 }
  0x2b   :  { %1936 = vmatmul.mubr.msk.f32.gmra.mxu0 %vm68_vm0, %v41_v26 }
  0x2c   :  { %1938 = vmatprep.mubr.msk.f32.mxu0 %vm68_vm0, %v42_v27 }
  0x2f   :  { %1939 = vmatmul.mubr.msk.f32.gmra.mxu0 %vm68_vm0, %v43_v28 }
  0x30   :  { %1941 = vmatprep.mubr.msk.f32.mxu0 %vm68_vm0, %v44_v29 }
  0x33   :  { %1942 = vmatmul.mubr.msk.f32.gmra.mxu0 %vm68_vm0, %v45_v30 }
  0x34   :  { %1944 = vmatprep.mubr.msk.f32.mxu0 %vm68_vm0, %v46_v31 }
  0x37   :  { %1945 = vmatmul.mubr.msk.f32.gmra.mxu0 %vm68_vm0, %v47_v32 }
  0x38   :  { %1947 = vmatprep.mubr.msk.f32.mxu0 %vm68_vm0, %v48_v33 }
  0x3b   :  { %1948 = vmatmul.mubr.msk.f32.gmra.mxu0 %vm68_vm0, %v49_v34 }
  0x3c   :  { %1950 = vmatprep.mubr.msk.f32.mxu0 %vm68_vm0, %v50_v35 }
  0x3f   :  { %1951 = vmatmul.mubr.msk.f32.gmra.mxu0 %vm68_vm0, %v51_v36 }
  0x80   :  { %v2379_v24 = vpop.permute.xlu0 %536 }
  0xcb   :  { %v1913_v38 = vpop.f32.mrf.mxu0  ;;  %v1955_v39 = vpop.f32.mrf.mxu1 }
  0xcc   :  { %v2329_v40 = vadd.f32 %v1913_v38, %v2326_v37  ;;  %v2332_v41 = vadd.f32 %v1955_v39, %v2326_v37 }
  0xcd   :  { %v231_v42 = vpop.f32.mrf.mxu0  ;;  %v371_v43 = vpop.f32.mrf.mxu1 }
  0xce   :  { %2926 = vst [vmem:[#allocation5_spill] sm:$0xff] %v2329_v40  ;;  %2927 = vst [vmem:[#allocation6_spill] sm:$0xff] %v2332_v41  ;;  %v2335_v44 = vadd.f32 %v2326_v37, %v231_v42  ;;  %v2338_v45 = vadd.f32 %v2326_v37, %v371_v43  ;;  %v392_v48 = vsel %vm390_vm1, %v2329_v40, -inf }
  0xcf   :  { %v1916_v46 = vpop.f32.mrf.mxu0  ;;  %v1958_v47 = vpop.f32.mrf.mxu1 }
  0xd0   :  { %2928 = vst [vmem:[#allocation7_spill] sm:$0xff] %v2335_v44  ;;  %2929 = vst [vmem:[#allocation8_spill] sm:$0xff] %v2338_v45  ;;  %v391_v49 = vsel %vm390_vm1, %v2335_v44, -inf  ;;  %v2345_v50 = vadd.f32 %v1916_v46, %v2326_v37  ;;  %v2348_v51 = vadd.f32 %v1958_v47, %v2326_v37 }
  0xd1   :  { %v393_v52 = vmax.f32 %v391_v49, %v392_v48  ;;  %v241_v53 = vpop.f32.mrf.mxu0  ;;  %v381_v54 = vpop.f32.mrf.mxu1 }
  0xd2   :  { %2930 = vst [vmem:[#allocation9_spill] sm:$0xff] %v2345_v50  ;;  %2931 = vst [vmem:[#allocation10_spill] sm:$0xff] %v2348_v51  ;;  %v527_v55 = vsel %vm390_vm1, %v2348_v51, -inf  ;;  %v2353_v56 = vadd.f32 %v2326_v37, %v241_v53  ;;  %v2356_v57 = vadd.f32 %v2326_v37, %v381_v54  ;;  %v401_v60 = vsel %vm390_vm1, %v2345_v50, -inf }
  0xd3   :  { %v394_v58 = vrot.slane %v393_v52, 4  ;;  %v1919_v59 = vpop.f32.mrf.mxu0 }
  0xd4   :  { %2932 = vst [vmem:[#allocation11_spill] sm:$0xff] %v2353_v56  ;;  %v400_v61 = vsel %vm390_vm1, %v2353_v56, -inf  ;;  %v526_v62 = vsel %vm390_vm1, %v2356_v57, -inf  ;;  %v2365_v63 = vadd.f32 %v1919_v59, %v2326_v37 }
  0xd5   :  { %v395_v1 = vmax.f32 %v393_v52, %v394_v58  ;;  %v402_v2 = vmax.f32 %v400_v61, %v401_v60  ;;  %v528_v3 = vmax.f32 %v526_v62, %v527_v55  ;;  %v251_v4 = vpop.f32.mrf.mxu0 }
  0xd6   :  { %2933 = vst [vmem:[#allocation12_spill] sm:$0xff] %v2365_v63  ;;  %v2368_v5 = vadd.f32 %v2326_v37, %v251_v4  ;;  %v410_v9 = vsel %vm390_vm1, %v2365_v63, -inf }
  0xd7   :  { %v396_v6 = vrot.slane %v395_v1, 2  ;;  %v403_v7 = vrot.slane %v402_v2, 4  ;;  %v529_v8 = vrot.slane %v528_v3, 4  ;;  %v1922_v10 = vpop.f32.mrf.mxu0 }
  0xd8   :  { %v409_v12 = vsel %vm390_vm1, %v2368_v5, -inf  ;;  %v2387_v35 = vadd.f32 %v1922_v10, %v2326_v37 }
  0xd9   :  { %v397_v14 = vmax.f32 %v395_v1, %v396_v6  ;;  %v404_v15 = vmax.f32 %v402_v2, %v403_v7  ;;  %v530_v16 = vmax.f32 %v528_v3, %v529_v8  ;;  %v261_v17 = vpop.f32.mrf.mxu0  ;;  %v411_v18 = vmax.f32 %v409_v12, %v410_v9 }
  0xda   :  { %v2392_v42 = vadd.f32 %v2326_v37, %v261_v17  ;;  %v419_v54 = vsel %vm390_vm1, %v2387_v35, -inf }
  0xdb   :  { %v398_v19 = vrot.slane %v397_v14, 1  ;;  %v405_v20 = vrot.slane %v404_v15, 2  ;;  %v1925_v21 = vpop.f32.mrf.mxu0  ;;  %v531_v22 = vrot.slane %v530_v16, 2  ;;  %v412_v23 = vrot.slane %v411_v18, 4 }
  0xdc   :  { %v418_v61 = vsel %vm390_vm1, %v2392_v42, -inf  ;;  %v2410_v62 = vadd.f32 %v1925_v21, %v2326_v37 }
  0xdd   :  { %v399_v26 = vmax.f32 %v397_v14, %v398_v19  ;;  %v406_v27 = vmax.f32 %v404_v15, %v405_v20  ;;  %v271_v28 = vpop.f32.mrf.mxu0  ;;  %v413_v29 = vmax.f32 %v411_v18, %v412_v23  ;;  %v532_v33 = vmax.f32 %v530_v16, %v531_v22 }
  0xde   :  { %v2413_v0 = vadd.f32 %v2326_v37, %v271_v28  ;;  %v420_v9 = vmax.f32 %v418_v61, %v419_v54  ;;  %v428_v13 = vsel %vm390_vm1, %v2410_v62, -inf }
  0xdf   :  { %v407_v30 = vrot.slane %v406_v27, 1  ;;  %v1928_v31 = vpop.f32.mrf.mxu0  ;;  %v2384_v32 = vmax.f32 %v399_v26, %v2379_v24  ;;  %v414_v39 = vrot.slane %v413_v29, 2  ;;  %v533_v53 = vrot.slane %v532_v33, 1 }
  0xe0   :  { %v2395_v43 = vadd.f32 %v1928_v31, %v2326_v37  ;;  %v427_v14 = vsel %vm390_vm1, %v2413_v0, -inf  ;;  %v421_v28 = vrot.slane %v420_v9, 4 }
  0xe1   :  { %v408_v34 = vmax.f32 %v406_v27, %v407_v30  ;;  %v281_v36 = vpop.f32.mrf.mxu0  ;;  %v558_v38 = vrot.slane %v2384_v32, %v2381_v25  ;;  %v415_v60 = vmax.f32 %v413_v29, %v414_v39  ;;  %v534_v6 = vmax.f32 %v532_v33, %v533_v53 }
  0xe2   :  { %v2398_v46 = vadd.f32 %v2326_v37, %v281_v36  ;;  %v437_v1 = vsel %vm390_vm1, %v2395_v43, -inf  ;;  %v429_v29 = vmax.f32 %v427_v14, %v428_v13 }
  0xe3   :  { %v1931_v47 = vpop.f32.mrf.mxu0  ;;  %v620_v48 = vsub.f32 %v2329_v40, %v558_v38  ;;  %v619_v49 = vsub.f32 %v2335_v44, %v558_v38  ;;  %v2403_v52 = vmax.f32 %v408_v34, %v2379_v24  ;;  %v416_v12 = vrot.slane %v415_v60, 1 }
  0xe4   :  { %v436_v2 = vsel %vm390_vm1, %v2398_v46, -inf  ;;  %v2428_v17 = vadd.f32 %v1931_v47, %v2326_v37  ;;  %v2434_v20 = vmax.f32 %v534_v6, %v2379_v24  ;;  %v430_v6 = vrot.slane %v429_v29, 4 }
  0xe5   :  { %v291_v55 = vpop.f32.mrf.mxu0  ;;  %v653_v58 = vmul.f32 1.442695, %v620_v48  ;;  %v651_v59 = vmul.f32 1.442695, %v619_v49  ;;  %v562_v4 = vrot.slane %v2403_v52, %v2381_v25  ;;  %v438_v10 = vmax.f32 %v436_v2, %v437_v1 }
  0xe6   :  { %v2431_v18 = vadd.f32 %v2326_v37, %v291_v55  ;;  %v2444_v27 = vrot.slane %v2434_v20, %v2381_v25  ;;  %v417_v31 = vmax.f32 %v415_v60, %v416_v12  ;;  %v446_v33 = vsel %vm390_vm1, %v2428_v17, -inf }
  0xe7   :  { %v1934_v3 = vpop.f32.mrf.mxu0  ;;  %2043 = vpow2.f32 %v653_v58  ;;  %v621_v8 = vsub.f32 %v2353_v56, %v562_v4  ;;  %v622_v11 = vsub.f32 %v2345_v50, %v562_v4  ;;  %v439_v26 = vrot.slane %v438_v10, 4 }
  0xe8   :  { %2045 = vpow2.f32 %v651_v59  ;;  %v2437_v21 = vadd.f32 %v1934_v3, %v2326_v37  ;;  %v445_v34 = vsel %vm390_vm1, %v2431_v18, -inf  ;;  %v650_v36 = vsub.f32 %v2348_v51, %v2444_v27 }
  0xe9   :  { %v301_v7 = vpop.f32.mrf.mxu0  ;;  %v655_v16 = vmul.f32 1.442695, %v621_v8  ;;  %v657_v19 = vmul.f32 1.442695, %v622_v11  ;;  %v440_v53 = vmax.f32 %v438_v10, %v439_v26  ;;  %v518_v55 = vsel %vm390_vm1, %v2332_v41, -inf }
  0xea   :  { %v2440_v22 = vadd.f32 %v2326_v37, %v301_v7  ;;  %v455_v38 = vsel %vm390_vm1, %v2437_v21, -inf  ;;  %v713_v54 = vmul.f32 1.442695, %v650_v36  ;;  %v422_v58 = vmax.f32 %v420_v9, %v421_v28 }
  0xeb   :  { %v1937_v15 = vpop.f32.mrf.mxu0  ;;  %2047 = vpow2.f32 %v655_v16  ;;  %v447_v59 = vmax.f32 %v445_v34, %v446_v33  ;;  %v2476_v10 = vmax.f32 %v417_v31, %v2379_v24  ;;  %v517_v11 = vsel %vm390_vm1, %v2338_v45, -inf }
  0xec   :  { %2049 = vpow2.f32 %v657_v19  ;;  %v454_v39 = vsel %vm390_vm1, %v2440_v22, -inf  ;;  %v2457_v47 = vadd.f32 %v1937_v15, %v2326_v37  ;;  %v441_v12 = vrot.slane %v440_v53, 2 }
  0xed   :  { %v311_v23 = vpop.f32.mrf.mxu0  ;;  %v456_v1 = vmax.f32 %v454_v39, %v455_v38  ;;  %2051 = vpow2.f32 %v713_v54  ;;  %v448_v15 = vrot.slane %v447_v59, 4  ;;  %v423_v31 = vrot.slane %v422_v58, 2 }
  0xee   :  { %v2460_v48 = vadd.f32 %v2326_v37, %v311_v23  ;;  %v464_v7 = vsel %vm390_vm1, %v2457_v47, -inf  ;;  %v431_v33 = vmax.f32 %v429_v29, %v430_v6  ;;  %v2493_v36 = vrot.slane %v2476_v10, %v2381_v25 }
  0xef   :  { %v1940_v30 = vpop.f32.mrf.mxu0  ;;  %v457_v19 = vrot.slane %v456_v1, 4  ;;  %v442_v38 = vmax.f32 %v440_v53, %v441_v12 }
  0xf0   :  { %2934 = vst [vmem:[#allocation13_spill] sm:$0xff] %v2460_v48  ;;  %v2465_v2 = vadd.f32 %v1940_v30, %v2326_v37  ;;  %v463_v8 = vsel %vm390_vm1, %v2460_v48, -inf  ;;  %v519_v30 = vmax.f32 %v517_v11, %v518_v55  ;;  %v624_v12 = vsub.f32 %v2365_v63, %v2493_v36 }
  0xf1   :  { %v321_v49 = vpop.f32.mrf.mxu0  ;;  %v465_v23 = vmax.f32 %v463_v8, %v464_v7  ;;  %v458_v6 = vmax.f32 %v456_v1, %v457_v19 }
  0xf2   :  { %v2468_v3 = vadd.f32 %v2326_v37, %v321_v49  ;;  %v473_v26 = vsel %vm390_vm1, %v2465_v2, -inf  ;;  %v520_v8 = vrot.slane %v519_v30, 4 }
  0xf3   :  { %v1943_v60 = vpop.f32.mrf.mxu0  ;;  %v466_v7 = vrot.slane %v465_v23, 4 }
  0xf4   :  { %v2044_v61 = vpop.eup %2043  ;;  %v2481_v13 = vadd.f32 %v1943_v60, %v2326_v37  ;;  %v472_v28 = vsel %vm390_vm1, %v2468_v3, -inf  ;;  %v521_v44 = vmax.f32 %v519_v30, %v520_v8 }
  0xf5   :  { %v2046_v4 = vpop.eup %2045  ;;  %v331_v9 = vpop.f32.mrf.mxu0  ;;  %820 = vrot.lane.b32.xlu1 %v2044_v61, %s2141_s24  ;;  %v449_v61 = vmax.f32 %v447_v59, %v448_v15  ;;  %v474_v55 = vmax.f32 %v472_v28, %v473_v26  ;;  %v432_v59 = vrot.slane %v431_v33, 2  ;;  %v443_v15 = vrot.slane %v442_v38, 1 }
  0xf6   :  { %v2484_v14 = vadd.f32 %v2326_v37, %v331_v9  ;;  %818 = vrot.lane.b32.xlu0 %v2046_v4, %s2141_s24  ;;  %v482_v39 = vsel %vm390_vm1, %v2481_v13, -inf }
  0xf7   :  { %v1946_v16 = vpop.f32.mrf.mxu0  ;;  %v450_v19 = vrot.slane %v449_v61, 2  ;;  %v475_v26 = vrot.slane %v474_v55, 4  ;;  %v433_v63 = vmax.f32 %v431_v33, %v432_v59  ;;  %v444_v51 = vmax.f32 %v442_v38, %v443_v15 }
  0xf8   :  { %v481_v49 = vsel %vm390_vm1, %v2484_v14, -inf  ;;  %v2500_v54 = vadd.f32 %v1946_v16, %v2326_v37  ;;  %v2048_v60 = vpop.eup %2047  ;;  %v424_v16 = vmax.f32 %v422_v58, %v423_v31  ;;  %v661_v31 = vmul.f32 1.442695, %v624_v12 }
  0xf9   :  { %v341_v34 = vpop.f32.mrf.mxu0  ;;  %v2050_v29 = vpop.eup %2049  ;;  %822 = vrot.lane.b32.xlu1 %v2048_v60, %s2141_s24  ;;  %v483_v53 = vmax.f32 %v481_v49, %v482_v39  ;;  %v467_v49 = vmax.f32 %v465_v23, %v466_v7  ;;  %v451_v41 = vmax.f32 %v449_v61, %v450_v19  ;;  %v522_v61 = vrot.slane %v521_v44, 2 }
  0xfa   :  { %v2504_v9 = vadd.f32 %v2326_v37, %v341_v34  ;;  %824 = vrot.lane.b32.xlu0 %v2050_v29, %s2141_s24  ;;  %v491_v1 = vsel %vm390_vm1, %v2500_v54, -inf  ;;  %v459_v34 = vrot.slane %v458_v6, 2  ;;  %v2052_v29 = vpop.eup %2051  ;;  %v425_v50 = vrot.slane %v424_v16, 1 }
  0xfb   :  { %v1949_v4 = vpop.f32.mrf.mxu0  ;;  %v484_v40 = vrot.slane %v483_v53, 4  ;;  %v468_v30 = vrot.slane %v467_v49, 2  ;;  %2053 = vpow2.f32 %v661_v31  ;;  %v452_v59 = vrot.slane %v451_v41, 1 }
  0xfc   :  { %2935 = vst [vmem:[#allocation14_spill] sm:$0xff] %v2504_v9  ;;  %v490_v28 = vsel %vm390_vm1, %v2504_v9, -inf  ;;  %v2514_v60 = vadd.f32 %v1949_v4, %v2326_v37  ;;  %v476_v9 = vmax.f32 %v474_v55, %v475_v26  ;;  %v460_v7 = vmax.f32 %v458_v6, %v459_v34 }
  0xfd   :  { %v351_v11 = vpop.f32.mrf.mxu0  ;;  %v492_v58 = vmax.f32 %v490_v28, %v491_v1  ;;  %880 = vrot.lane.b32.xlu1 %v2052_v29, %s2141_s24  ;;  %v485_v33 = vmax.f32 %v483_v53, %v484_v40  ;;  %v434_v55 = vrot.slane %v433_v63, 1  ;;  %v426_v19 = vmax.f32 %v424_v16, %v425_v50 }
  0xfe   :  { %v2517_v45 = vadd.f32 %v2326_v37, %v351_v11  ;;  %v500_v8 = vsel %vm390_vm1, %v2514_v60, -inf  ;;  %v477_v15 = vrot.slane %v476_v9, 2  ;;  %v2533_v26 = vmax.f32 %v444_v51, %v2379_v24 }
  0xff   :  { %v1952_v39 = vpop.f32.mrf.mxu0  ;;  %v493_v23 = vrot.slane %v492_v58, 4  ;;  %v486_v53 = vrot.slane %v485_v33, 2  ;;  %v523_v34 = vmax.f32 %v521_v44, %v522_v61  ;;  %v435_v31 = vmax.f32 %v433_v63, %v434_v55 }
 0x100   :  { %v2521_v4 = vadd.f32 %v1952_v39, %v2326_v37  ;;  %v499_v11 = vsel %vm390_vm1, %v2517_v45, -inf  ;;  %v2541_v51 = vrot.slane %v2533_v26, %v2381_v25  ;;  %v623_v55 = vsub.f32 %v2368_v5, %v2493_v36 }
 0x101   :  { %v361_v56 = vpop.f32.mrf.mxu0  ;;  %v494_v38 = vmax.f32 %v492_v58, %v493_v23  ;;  %v501_v1 = vmax.f32 %v499_v11, %v500_v8  ;;  %v649_v58 = vsub.f32 %v2356_v57, %v2444_v27  ;;  %v453_v23 = vmax.f32 %v451_v41, %v452_v59 }
 0x102   :  { %2936 = vst [vmem:[#allocation15_spill] sm:$0xff] %v2521_v4  ;;  %v2526_v12 = vadd.f32 %v2326_v37, %v361_v56  ;;  %v509_v6 = vsel %vm390_vm1, %v2521_v4, -inf  ;;  %v461_v37 = vrot.slane %v460_v7, 1  ;;  %v469_v56 = vmax.f32 %v467_v49, %v468_v30 }
 0x103   :  { %v495_v28 = vrot.slane %v494_v38, 2  ;;  %v502_v39 = vrot.slane %v501_v1, 4  ;;  %v478_v8 = vmax.f32 %v476_v9, %v477_v15  ;;  %v711_v11 = vmul.f32 1.442695, %v649_v58 }
 0x104   :  { %v508_v40 = vsel %vm390_vm1, %v2526_v12, -inf  ;;  %v2544_v49 = vmax.f32 %v426_v19, %v2379_v24  ;;  %v462_v30 = vmax.f32 %v460_v7, %v461_v37  ;;  %v470_v4 = vrot.slane %v469_v56, 1 }
 0x105   :  { %v510_v29 = vmax.f32 %v508_v40, %v509_v6  ;;  %v503_v50 = vmax.f32 %v501_v1, %v502_v39  ;;  %v487_v44 = vmax.f32 %v485_v33, %v486_v53  ;;  %v496_v61 = vmax.f32 %v494_v38, %v495_v28 }
 0x106   :  { %2055 = vpow2.f32 %v711_v11  ;;  %v570_v41 = vrot.slane %v2544_v49, %v2381_v25  ;;  %v524_v63 = vrot.slane %v523_v34, 1  ;;  %v2549_v27 = vmax.f32 %v453_v23, %v2379_v24 }
 0x107   :  { %v511_v16 = vrot.slane %v510_v29, 4  ;;  %v504_v6 = vrot.slane %v503_v50, 2  ;;  %v479_v9 = vrot.slane %v478_v8, 1  ;;  %v2555_v38 = vmax.f32 %v435_v31, %v2379_v24 }
 0x108   :  { %v626_v33 = vsub.f32 %v2387_v35, %v570_v41  ;;  %v630_v15 = vsub.f32 %v2395_v43, %v2541_v51  ;;  %v2560_v1 = vmax.f32 %v462_v30, %v2379_v24  ;;  %v488_v19 = vrot.slane %v487_v44, 1  ;;  %v2054_v53 = vpop.eup %2053 }
 0x109   :  { %v512_v40 = vmax.f32 %v510_v29, %v511_v16  ;;  %v505_v59 = vmax.f32 %v503_v50, %v504_v6  ;;  %v659_v37 = vmul.f32 1.442695, %v623_v55  ;;  %v471_v28 = vmax.f32 %v469_v56, %v470_v4  ;;  %828 = vrot.lane.b32.xlu0 %v2054_v53, %s2141_s24 }
 0x10a   :  { %v497_v39 = vrot.slane %v496_v61, 1  ;;  %v665_v36 = vmul.f32 1.442695, %v626_v33  ;;  %v582_v58 = vrot.slane %v2549_v27, %v2381_v25  ;;  %v574_v31 = vrot.slane %v2555_v38, %v2381_v25 }
 0x10b   :  { %v513_v7 = vrot.slane %v512_v40, 2  ;;  %v506_v23 = vrot.slane %v505_v59, 1  ;;  %2057 = vpow2.f32 %v659_v37  ;;  %v480_v50 = vmax.f32 %v478_v8, %v479_v9 }
 0x10c   :  { %2059 = vpow2.f32 %v665_v36  ;;  %v625_v11 = vsub.f32 %v2392_v42, %v570_v41  ;;  %v673_v4 = vmul.f32 1.442695, %v630_v15  ;;  %v2570_v56 = vrot.slane %v2560_v1, %v2381_v25 }
 0x10d   :  { %v514_v29 = vmax.f32 %v512_v40, %v513_v7  ;;  %v489_v30 = vmax.f32 %v487_v44, %v488_v19  ;;  %v628_v6 = vsub.f32 %v2410_v62, %v574_v31  ;;  %v547_v40 = vmax.f32 %v471_v28, %v2379_v24 }
 0x10e   :  { %v498_v55 = vmax.f32 %v496_v61, %v497_v39  ;;  %v663_v7 = vmul.f32 1.442695, %v625_v11  ;;  %v627_v33 = vsub.f32 %v2413_v0, %v574_v31  ;;  %v632_v8 = vsub.f32 %v2428_v17, %v582_v58 }
 0x10f   :  { %v515_v16 = vrot.slane %v514_v29, 1  ;;  %v507_v9 = vmax.f32 %v505_v59, %v506_v23  ;;  %v669_v37 = vmul.f32 1.442695, %v628_v6  ;;  %v735_v41 = vrot.slane %v2403_v52, 7 }
 0x110   :  { %v525_v15 = vmax.f32 %v523_v34, %v524_v63  ;;  %v629_v53 = vsub.f32 %v2398_v46, %v2541_v51  ;;  %v548_v44 = vmax.f32 %v480_v50, %v2379_v24  ;;  %v634_v28 = vsub.f32 %v2437_v21, %v2570_v56 }
 0x111   :  { %v516_v19 = vmax.f32 %v514_v29, %v515_v16  ;;  %v549_v61 = vmax.f32 %v489_v30, %v2379_v24  ;;  %2061 = vpow2.f32 %v669_v37  ;;  %v737_v39 = vsel %vm736_vm3, %v735_v41, %v2384_v32 }
 0x112   :  { %v2586_v59 = vrot.slane %v547_v40, %v2381_v25  ;;  %v550_v52 = vmax.f32 %v498_v55, %v2379_v24  ;;  %2063 = vpow2.f32 %v663_v7  ;;  %v667_v34 = vmul.f32 1.442695, %v627_v33 }
 0x113   :  { %v2056_v51 = vpop.eup %2055  ;;  %2065 = vpow2.f32 %v673_v4  ;;  %v677_v63 = vmul.f32 1.442695, %v632_v8  ;;  %v2590_v29 = vmax.f32 %v507_v9, %v2379_v24  ;;  %v738_v36 = vrot.slane %v2476_v10, 6 }
 0x114   :  { %v671_v23 = vmul.f32 1.442695, %v629_v53  ;;  %v756_v31 = vrot.slane %v548_v44, 7  ;;  %v2594_v50 = vmax.f32 %v516_v19, %v2379_v24  ;;  %878 = vrot.lane.b32.xlu1 %v2056_v51, %s2141_s24  ;;  %v2598_v32 = vmax.f32 %v525_v15, %v2379_v24 }
 0x115   :  { %v631_v16 = vsub.f32 %v2431_v18, %v582_v58  ;;  %v758_v11 = vrot.slane %v549_v61, 6  ;;  %v740_v4 = vsel %vm739_vm4, %v738_v36, %v737_v39  ;;  %v741_v30 = vrot.slane %v2544_v49, 5 }
 0x116   :  { %v681_v6 = vmul.f32 1.442695, %v634_v28  ;;  %v636_v10 = vsub.f32 %v2457_v47, %v2586_v59  ;;  %v760_v55 = vrot.slane %v550_v52, 5  ;;  %2067 = vpow2.f32 %v667_v34 }
 0x117   :  { %2069 = vpow2.f32 %v677_v63  ;;  %v594_v7 = vrot.slane %v548_v44, %v2381_v25  ;;  %v762_v33 = vrot.slane %v2590_v29, 4  ;;  %v2608_v24 = vsel %vm742_vm5, %v741_v30, %v740_v4 }
 0x118   :  { %v2058_v58 = vpop.eup %2057  ;;  %v757_v8 = vsel %vm736_vm3, %v756_v31, %v547_v40  ;;  %v764_v49 = vrot.slane %v2594_v50, 3  ;;  %2071 = vpow2.f32 %v671_v23  ;;  %v675_v37 = vmul.f32 1.442695, %v631_v16 }
 0x119   :  { %v2060_v9 = vpop.eup %2059  ;;  %826 = vrot.lane.b32.xlu1 %v2058_v58, %s2141_s24  ;;  %v759_v41 = vsel %vm739_vm4, %v758_v11, %v757_v8  ;;  %v633_v15 = vsub.f32 %v2440_v22, %v2570_v56  ;;  %2073 = vpow2.f32 %v681_v6  ;;  %v685_v53 = vmul.f32 1.442695, %v636_v10 }
 0x11a   :  { %832 = vrot.lane.b32.xlu0 %v2060_v9, %s2141_s24  ;;  %v761_v44 = vsel %vm742_vm5, %v760_v55, %v759_v41  ;;  %v638_v40 = vsub.f32 %v2465_v2, %v594_v7  ;;  %v598_v19 = vrot.slane %v549_v61, %v2381_v25  ;;  %v766_v39 = vrot.slane %v2598_v32, 2  ;;  %v2937_v41 = vld [vmem:[#allocation14_spill] sm:$0xff] }
 0x11b   :  { %v763_v28 = vsel %vm745_vm6, %v762_v33, %v761_v44  ;;  %v768_v51 = vrot.slane %v2434_v20, 1  ;;  %2075 = vpow2.f32 %v675_v37  ;;  %v679_v36 = vmul.f32 1.442695, %v633_v15 }
 0x11c   :  { %v765_v34 = vsel %vm748_vm7, %v764_v49, %v763_v28  ;;  %v635_v23 = vsub.f32 %v2460_v48, %v2586_v59  ;;  %2077 = vpow2.f32 %v685_v53  ;;  %v689_v16 = vmul.f32 1.442695, %v638_v40 }
 0x11d   :  { %v767_v56 = vsel %vm751_vm8, %v766_v39, %v765_v34  ;;  %v640_v11 = vsub.f32 %v2481_v13, %v598_v19  ;;  %v602_v4 = vrot.slane %v550_v52, %v2381_v25  ;;  %2079 = vpow2.f32 %v679_v36 }
 0x11e   :  { %v2062_v63 = vpop.eup %2061  ;;  %v2628_v61 = vsel %vm754_vm9, %v768_v51, %v767_v56  ;;  %v683_v30 = vmul.f32 1.442695, %v635_v23  ;;  %v637_v6 = vsub.f32 %v2468_v3, %v594_v7  ;;  %2081 = vpow2.f32 %v689_v16  ;;  %v2938_v51 = vld [vmem:[#allocation6_spill] sm:$0xff]  ;;  %v2939_v16 = vld [vmem:[#allocation8_spill] sm:$0xff] }
 0x11f   :  { %v2064_v31 = vpop.eup %2063  ;;  %836 = vrot.lane.b32.xlu0 %v2062_v63, %s2141_s24  ;;  %v693_v10 = vmul.f32 1.442695, %v640_v11  ;;  %v642_v55 = vsub.f32 %v2500_v54, %v602_v4  ;;  %v606_v33 = vrot.slane %v2590_v29, %v2381_v25  ;;  %v639_v49 = vsub.f32 %v2484_v14, %v598_v19 }
 0x120   :  { %v2066_v20 = vpop.eup %2065  ;;  %830 = vrot.lane.b32.xlu1 %v2064_v31, %s2141_s24  ;;  %2083 = vpow2.f32 %v683_v30  ;;  %v687_v8 = vmul.f32 1.442695, %v637_v6  ;;  %v641_v15 = vsub.f32 %v2937_v41, %v602_v4  ;;  %v614_v53 = vrot.slane %v2598_v32, %v2381_v25 }
 0x121   :  { %2085 = vpow2.f32 %v693_v10  ;;  %v697_v7 = vmul.f32 1.442695, %v642_v55  ;;  %v643_v37 = vsub.f32 %v2517_v45, %v606_v33  ;;  %v691_v29 = vmul.f32 1.442695, %v639_v49 }
 0x122   :  { %2087 = vpow2.f32 %v687_v8  ;;  %v644_v28 = vsub.f32 %v2514_v60, %v606_v33  ;;  %v610_v39 = vrot.slane %v2594_v50, %v2381_v25  ;;  %v695_v34 = vmul.f32 1.442695, %v641_v15  ;;  %v2940_v50 = vld [vmem:[#allocation15_spill] sm:$0xff] }
 0x123   :  { %v2068_v59 = vpop.eup %2067  ;;  %840 = vrot.lane.b32.xlu0 %v2066_v20, %s2141_s24  ;;  %2089 = vpow2.f32 %v697_v7  ;;  %v699_v40 = vmul.f32 1.442695, %v643_v37  ;;  %v648_v56 = vsub.f32 %v2938_v51, %v614_v53  ;;  %v647_v11 = vsub.f32 %v2939_v16, %v614_v53 }
 0x124   :  { %v2070_v52 = vpop.eup %2069  ;;  %834 = vrot.lane.b32.xlu1 %v2068_v59, %s2141_s24  ;;  %2091 = vpow2.f32 %v691_v29  ;;  %v701_v36 = vmul.f32 1.442695, %v644_v28  ;;  %v645_v23 = vsub.f32 %v2526_v12, %v610_v39  ;;  %v646_v20 = vsub.f32 %v2940_v50, %v610_v39 }
 0x125   :  { %v2072_v58 = vpop.eup %2071  ;;  %2093 = vpow2.f32 %v699_v40  ;;  %v709_v31 = vmul.f32 1.442695, %v648_v56  ;;  %v707_v6 = vmul.f32 1.442695, %v647_v11  ;;  %v747_v7 = vrot.slane %v2533_v26, 3 }
 0x126   :  { %v2074_v9 = vpop.eup %2073  ;;  %2095 = vpow2.f32 %v695_v34  ;;  %v703_v30 = vmul.f32 1.442695, %v645_v23  ;;  %v705_v55 = vmul.f32 1.442695, %v646_v20  ;;  %v750_v29 = vrot.slane %v2549_v27, 2  ;;  %v2686_v27 = vld [vmem:[%s2905_s4 + $0x8] sm:$0xff] }
 0x127   :  { %844 = vrot.lane.b32.xlu0 %v2070_v52, %s2141_s24  ;;  %2097 = vpow2.f32 %v701_v36  ;;  %v753_v53 = vrot.slane %v2560_v1, 1  ;;  %978 = vmatprep.mubr.f32.mxu0 %v2686_v27 }
 0x128   :  { %838 = vrot.lane.b32.xlu1 %v2072_v58, %s2141_s24  ;;  %v2076_v44 = vpop.eup %2075  ;;  %2099 = vpow2.f32 %v709_v31 }
 0x129   :  { %v2078_v19 = vpop.eup %2077  ;;  %2101 = vpow2.f32 %v703_v30 }
 0x12a   :  { %v2080_v63 = vpop.eup %2079  ;;  %2103 = vpow2.f32 %v707_v6 }
 0x12b   :  { %848 = vrot.lane.b32.xlu0 %v2074_v9, %s2141_s24  ;;  %v2082_v32 = vpop.eup %2081  ;;  %2105 = vpow2.f32 %v705_v55  ;;  %v744_v9 = vrot.slane %v2555_v38, 4 }
 0x12c   :  { %842 = vrot.lane.b32.xlu1 %v2076_v44, %s2141_s24 }
 0x12d   :  { %v2084_v4 = vpop.eup %2083  ;;  %v746_v44 = vsel %vm745_vm6, %v744_v9, %v2608_v24 }
 0x12e   :  { %v2086_v25 = vpop.eup %2085  ;;  %v749_v40 = vsel %vm748_vm7, %v747_v7, %v746_v44  ;;  %v2117_v44 = vld [vmem:[%s2903_s2 + $0x1] ss:$0 sm:$0xff] }
 0x12f   :  { %852 = vrot.lane.b32.xlu0 %v2078_v19, %s2141_s24  ;;  %v2088_v59 = vpop.eup %2087  ;;  %v752_v38 = vsel %vm751_vm8, %v750_v29, %v749_v40 }
 0x130   :  { %846 = vrot.lane.b32.xlu1 %v2080_v63, %s2141_s24  ;;  %v2090_v10 = vpop.eup %2089  ;;  %v755_v26 = vsel %vm754_vm9, %v753_v53, %v752_v38 }
 0x131   :  { %v2092_v33 = vpop.eup %2091 }
 0x132   :  { %v2094_v52 = vpop.eup %2093 }
 0x133   :  { %856 = vrot.lane.b32.xlu0 %v2082_v32, %s2141_s24  ;;  %v2096_v58 = vpop.eup %2095 }
 0x134   :  { %850 = vrot.lane.b32.xlu1 %v2084_v4, %s2141_s24  ;;  %v2098_v8 = vpop.eup %2097 }
 0x135   :  { %v2100_v49 = vpop.eup %2099 }
 0x136   :  { %v2102_v37 = vpop.eup %2101 }
 0x137   :  { %860 = vrot.lane.b32.xlu0 %v2086_v25, %s2141_s24  ;;  %v2104_v15 = vpop.eup %2103 }
 0x138   :  { %854 = vrot.lane.b32.xlu1 %v2088_v59, %s2141_s24  ;;  %v2106_v19 = vpop.eup %2105 }
 0x13b   :  { %864 = vrot.lane.b32.xlu0 %v2090_v10, %s2141_s24 }
 0x13c   :  { %858 = vrot.lane.b32.xlu1 %v2092_v33, %s2141_s24 }
 0x13f   :  { %866 = vrot.lane.b32.xlu0 %v2094_v52, %s2141_s24 }
 0x140   :  { %862 = vrot.lane.b32.xlu1 %v2096_v58, %s2141_s24 }
 0x143   :  { %868 = vrot.lane.b32.xlu0 %v2098_v8, %s2141_s24 }
 0x144   :  { %876 = vrot.lane.b32.xlu1 %v2100_v49, %s2141_s24 }
 0x147   :  { %870 = vrot.lane.b32.xlu0 %v2102_v37, %s2141_s24 }
 0x148   :  { %874 = vrot.lane.b32.xlu1 %v2104_v15, %s2141_s24 }
 0x14b   :  { %872 = vrot.lane.b32.xlu0 %v2106_v19, %s2141_s24 }
 0x14c   :  { %770 = vrot.lane.b32.xlu1 %v755_v26, %s2141_s24 }
 0x14f   :  { %772 = vrot.lane.b32.xlu0 %v2628_v61, %s2141_s24 }
 0x167   :  { %v2689_v1 = vpop.permute.xlu1 %820 }
 0x168   :  { %v2691_v24 = vpop.permute.xlu0 %818 }
 0x169   :  { %1961 = vmatprep.mubr.msk.f32.mxu1 %vm992_vm10, %v2691_v24 }
 0x16a   :  { %1962 = vmatmul.mubr.msk.f32.vlgmr.msra.gmra.mxu1 %vm992_vm10, %v2689_v1 }
 0x16b   :  { %v2697_v28 = vpop.permute.xlu1 %822 }
 0x16c   :  { %v2699_v61 = vpop.permute.xlu0 %824  ;;  %1964 = vmatprep.mubr.msk.f32.mxu1 %vm992_vm10, %v2697_v28 }
 0x16e   :  { %1965 = vmatmul.mubr.msk.f32.gmra.mxu1 %vm992_vm10, %v2699_v61 }
 0x16f   :  { %v2705_v39 = vpop.permute.xlu1 %880 }
 0x170   :  { %1782 = vmatprep.subr.mxu0 %v2705_v39 }
 0x17b   :  { %v2708_v34 = vpop.permute.xlu0 %828 }
 0x186   :  { %v2710_v56 = vpop.permute.xlu1 %878 }
 0x18b   :  { %v2712_v63 = vpop.permute.xlu1 %826 }
 0x18c   :  { %v2714_v32 = vpop.permute.xlu0 %832  ;;  %1967 = vmatprep.mubr.msk.f32.mxu1 %vm992_vm10, %v2712_v63 }
 0x18d   :  { %1968 = vmatmul.mubr.msk.f32.gmra.mxu1 %vm992_vm10, %v2708_v34 }
 0x191   :  { %v837_v36 = vpop.permute.xlu0 %836 }
 0x192   :  { %v2720_v23 = vpop.permute.xlu1 %830 }
 0x193   :  { %1970 = vmatprep.mubr.msk.f32.mxu1 %vm992_vm10, %v2720_v23 }
 0x194   :  { %1971 = vmatmul.mubr.msk.f32.gmra.mxu1 %vm992_vm10, %v2714_v32 }
 0x195   :  { %v841_v31 = vpop.permute.xlu0 %840 }
 0x196   :  { %v835_v11 = vpop.permute.xlu1 %834 }
 0x197   :  { %1973 = vmatprep.mubr.msk.f32.mxu1 %vm992_vm10, %v835_v11 }
 0x198   :  { %1974 = vmatmul.mubr.msk.f32.gmra.mxu1 %vm992_vm10, %v837_v36 }
 0x199   :  { %v845_v4 = vpop.permute.xlu0 %844 }
 0x19a   :  { %v839_v25 = vpop.permute.xlu1 %838 }
 0x19b   :  { %1976 = vmatprep.mubr.msk.f32.mxu1 %vm992_vm10, %v839_v25 }
 0x19c   :  { %1977 = vmatmul.mubr.msk.f32.gmra.mxu1 %vm992_vm10, %v841_v31 }
 0x19d   :  { %v849_v20 = vpop.permute.xlu0 %848 }
 0x19e   :  { %1783 = vmatpush3.msra.mxu0 %v849_v20  ;;  %v843_v30 = vpop.permute.xlu1 %842 }
 0x19f   :  { %1784 = vmatprep.subr.mxu0 %v2710_v56  ;;  %1979 = vmatprep.mubr.msk.f32.mxu1 %vm992_vm10, %v843_v30 }
 0x1a0   :  { %1980 = vmatmul.mubr.msk.f32.gmra.mxu1 %vm992_vm10, %v845_v4 }
 0x1a1   :  { %v2733_v6 = vpop.permute.xlu0 %852 }
 0x1a2   :  { %v847_v59 = vpop.permute.xlu1 %846 }
 0x1a3   :  { %1785 = vmatpush3.msra.mxu0 %v847_v59  ;;  %1982 = vmatprep.mubr.msk.f32.mxu1 %vm992_vm10, %v847_v59 }
 0x1a4   :  { %1983 = vmatmul.mubr.msk.f32.gmra.mxu1 %vm992_vm10, %v849_v20 }
 0x1a5   :  { %v857_v10 = vpop.permute.xlu0 %856 }
 0x1a6   :  { %v2737_v55 = vpop.permute.xlu1 %850 }
 0x1a7   :  { %1985 = vmatprep.mubr.msk.f32.mxu1 %vm992_vm10, %v2737_v55 }
 0x1a8   :  { %1986 = vmatmul.mubr.msk.f32.gmra.mxu1 %vm992_vm10, %v2733_v6 }
 0x1a9   :  { %v861_v33 = vpop.permute.xlu0 %860 }
 0x1aa   :  { %v855_v52 = vpop.permute.xlu1 %854 }
 0x1ab   :  { %1988 = vmatprep.mubr.msk.f32.mxu1 %vm992_vm10, %v855_v52 }
 0x1ac   :  { %1989 = vmatmul.mubr.msk.f32.gmra.mxu1 %vm992_vm10, %v857_v10 }
 0x1ad   :  { %v865_v58 = vpop.permute.xlu0 %864 }
 0x1ae   :  { %v859_v8 = vpop.permute.xlu1 %858 }
 0x1af   :  { %1991 = vmatprep.mubr.msk.f32.mxu1 %vm992_vm10, %v859_v8 }
 0x1b0   :  { %1992 = vmatmul.mubr.msk.f32.gmra.mxu1 %vm992_vm10, %v861_v33 }
 0x1b1   :  { %v867_v49 = vpop.permute.xlu0 %866 }
 0x1b2   :  { %v863_v9 = vpop.permute.xlu1 %862 }
 0x1b3   :  { %1994 = vmatprep.mubr.msk.f32.mxu1 %vm992_vm10, %v863_v9 }
 0x1b4   :  { %1995 = vmatmul.mubr.msk.f32.gmra.mxu1 %vm992_vm10, %v865_v58 }
 0x1b5   :  { %v869_v7 = vpop.permute.xlu0 %868  ;;  %1997 = vmatprep.mubr.msk.f32.mxu1 %vm992_vm10, %v867_v49 }
 0x1b6   :  { %v877_v37 = vpop.permute.xlu1 %876 }
 0x1b7   :  { %1786 = vmatprep.subr.mxu0 %v877_v37 }
 0x1b8   :  { %1787 = vmatpush3.msra.mxu0 %v845_v4  ;;  %1998 = vmatmul.mubr.msk.f32.gmra.mxu1 %vm992_vm10, %v869_v7 }
 0x1b9   :  { %v871_v29 = vpop.permute.xlu0 %870 }
 0x1ba   :  { %2000 = vmatprep.mubr.msk.f32.mxu1 %vm992_vm10, %v871_v29  ;;  %v875_v15 = vpop.permute.xlu1 %874 }
 0x1bb   :  { %1788 = vmatprep.subr.mxu0 %v875_v15 }
 0x1bc   :  { %1789 = vmatpush3.msra.mxu0 %v843_v30 }
 0x1bd   :  { %v873_v53 = vpop.permute.xlu0 %872 }
 0x1be   :  { %2001 = vmatmul.mubr.msk.f32.gmra.mxu1 %vm992_vm10, %v873_v53  ;;  %1790 = vmatprep.subr.mxu0 %v873_v53  ;;  %v771_v40 = vpop.permute.xlu1 %770 }
 0x1bf   :  { %2003 = vmatprep.mubr.msk.f32.mxu1 %vm992_vm10, %v875_v15  ;;  %1791 = vmatpush3.msra.mxu0 %v841_v31  ;;  %v776_v19 = vsub.f32 %v2117_v44, %v771_v40 }
 0x1c0   :  { %1792 = vmatprep.subr.mxu0 %v871_v29 }
 0x1c1   :  { %1793 = vmatpush3.msra.mxu0 %v839_v25  ;;  %v773_v38 = vpop.permute.xlu0 %772  ;;  %v778_v31 = vmul.f32 1.442695, %v776_v19 }
 0x1c2   :  { %2004 = vmatmul.mubr.msk.f32.gmra.mxu1 %vm992_vm10, %v877_v37  ;;  %1794 = vmatprep.subr.mxu0 %v869_v7  ;;  %v777_v26 = vsub.f32 %v2117_v44, %v773_v38 }
 0x1c3   :  { %2006 = vmatprep.mubr.msk.f32.mxu1 %vm992_vm10, %v2710_v56  ;;  %1795 = vmatpush3.msra.mxu0 %v837_v36  ;;  %2107 = vpow2.f32 %v778_v31 }
 0x1c4   :  { %1796 = vmatprep.subr.mxu0 %v867_v49  ;;  %v780_v56 = vmul.f32 1.442695, %v777_v26 }
 0x1c5   :  { %1797 = vmatpush3.msra.mxu0 %v835_v11 }
 0x1c6   :  { %2007 = vmatmul.mubr.msk.f32.gmra.mxu1 %vm992_vm10, %v2705_v39  ;;  %1798 = vmatprep.subr.mxu0 %v865_v58  ;;  %2109 = vpow2.f32 %v780_v56  ;;  %v2780_v39 = vld [vmem:[%s2905_s4 + $0x18] sm:$0xff] }
 0x1c7   :  { %1799 = vmatpush3.msra.mxu0 %v2714_v32  ;;  %1550 = vmatprep.mubr.f32.mxu1 %v2686_v27  ;;  %v2774_v27 = vld [vmem:[%s2905_s4] sm:$0xff]  ;;  %2942 = vst [vmem:[#allocation6_spill] sm:$0xff] %v2780_v39  ;;  %v2947_v56 = vld [vmem:[#allocation10_spill] sm:$0xff] }
 0x1c8   :  { %1800 = vmatprep.subr.mxu0 %v863_v9  ;;  %2941 = vst [vmem:[#allocation14_spill] sm:$0xff] %v2774_v27 }
 0x1c9   :  { %1801 = vmatpush3.msra.mxu0 %v2720_v23 }
 0x1ca   :  { %1802 = vmatprep.subr.mxu0 %v861_v33 }
 0x1cb   :  { %1803 = vmatpush3.msra.mxu0 %v2708_v34 }
 0x1cc   :  { %1804 = vmatprep.subr.mxu0 %v859_v8 }
 0x1cd   :  { %1805 = vmatpush3.msra.mxu0 %v2712_v63 }
 0x1ce   :  { %1806 = vmatprep.subr.mxu0 %v857_v10 }
 0x1cf   :  { %1807 = vmatpush3.msra.mxu0 %v2699_v61 }
 0x1d0   :  { %1808 = vmatprep.subr.mxu0 %v855_v52 }
 0x1d1   :  { %1809 = vmatpush3.msra.mxu0 %v2697_v28  ;;  %v2792_v28 = vld [vmem:[%s2905_s4 + $0x10] sm:$0xff] }
 0x1d2   :  { %1810 = vmatprep.subr.mxu0 %v2733_v6  ;;  %2943 = vst [vmem:[#allocation8_spill] sm:$0xff] %v2792_v28 }
 0x1d3   :  { %1811 = vmatpush3.msra.mxu0 %v2689_v1  ;;  %v2116_v1 = vld [vmem:[%s2904_s3] sm:$0xf] }
 0x1d4   :  { %1812 = vmatprep.subr.mxu0 %v2737_v55 }
 0x1d5   :  { %1813 = vmatpush3.msra.mxu0 %v2691_v24  ;;  %v2796_v24 = vpop.eup %2107 }
 0x1d6   :  { %979 = vmatmul.mubr.f32.vlgmr.msra.gmra.mxu0 %v2774_v27  ;;  %2009 = vmatprep.subr.msk.mxu0 %vm1057_vm2, %v2116_v1  ;;  %v2801_v61 = vpop.eup %2109 }
 0x1d7   :  { %983 = vmatprep.mubr.f32.mxu0 %v2780_v39  ;;  %2010 = vmatpush3.msk.msra.mxu0 %vm1057_vm2, %v2116_v1 }
 0x1d8   :  { %2014 = vmatprep.subr.msk.mxu0 %vm1057_vm2, %v2116_v1 }
 0x1da   :  { %984 = vmatmul.mubr.f32.gmra.mxu0 %v2792_v28 }
 0x1db   :  { %2011 = vmatprep.mubr.msk.f32.mxu0 %vm992_vm10, %v2796_v24 }
 0x1de   :  { %2012 = vmatmul.mubr.msk.f32.vlgmr.msra.gmra.mxu0 %vm992_vm10, %v2801_v61 }
 0x1df   :  { %2015 = vmatpush3.msk.msra.mxu0 %vm1057_vm2, %v2116_v1 }
 0x22a   :  { %v2806_v34 = vpop.f32.mrf.mxu1 }
 0x22b   :  { %2944 = vst [vmem:[#allocation15_spill] sm:$0xff] %v2806_v34 }
 0x22c   :  { %v2808_v63 = vpop.f32.mrf.mxu1 }
 0x22d   :  { %2945 = vst [vmem:[#allocation16_spill] sm:$0xff] %v2808_v63 }
 0x22e   :  { %v2810_v32 = vpop.f32.mrf.mxu1 }
 0x230   :  { %v2812_v36 = vpop.f32.mrf.mxu1 }
 0x24d   :  { %v2814_v23 = vpop.f32.mrf.mxu1 }
 0x24f   :  { %v2816_v11 = vpop.f32.mrf.mxu1 }
 0x254   :  { %v1972_v4 = vpop.f32.mrf.mxu1 }
 0x256   :  { %v2818_v25 = vpop.f32.mrf.mxu1 }
 0x258   :  { %v1975_v20 = vpop.f32.mrf.mxu1 }
 0x25a   :  { %v1167_v30 = vpop.f32.mrf.mxu1 }
 0x25c   :  { %v1978_v6 = vpop.f32.mrf.mxu1 }
 0x25e   :  { %v1177_v59 = vpop.f32.mrf.mxu1 }
 0x260   :  { %v1981_v10 = vpop.f32.mrf.mxu1 }
 0x261   :  { %v1461_v48 = vmul.f32 %v1981_v10, %v2428_v17 }
 0x262   :  { %v1187_v55 = vpop.f32.mrf.mxu1 }
 0x264   :  { %v1984_v33 = vpop.f32.mrf.mxu1 }
 0x265   :  { %v1463_v28 = vmul.f32 %v1984_v33, %v2437_v21 }
 0x266   :  { %v1197_v52 = vpop.f32.mrf.mxu1 }
 0x267   :  { %v1462_v63 = vmul.f32 %v1197_v52, %v2440_v22  ;;  %v1566_v52 = vld [vmem:[%s2906_s5 + $0x18] sm:$0xff] }
 0x268   :  { %v2820_v58 = vpop.f32.mrf.mxu1  ;;  %2019 = vmatprep.subr.mxu0 %v1566_v52 }
 0x26a   :  { %v2822_v8 = vpop.f32.mrf.mxu1 }
 0x26b   :  { %2946 = vst [vmem:[#allocation17_spill] sm:$0xff] %v2822_v8 }
 0x26c   :  { %v2824_v49 = vpop.f32.mrf.mxu1 }
 0x26e   :  { %v2826_v9 = vpop.f32.mrf.mxu1 }
 0x270   :  { %v1993_v7 = vpop.f32.mrf.mxu1 }
 0x272   :  { %v1227_v37 = vpop.f32.mrf.mxu1 }
 0x274   :  { %v1996_v29 = vpop.f32.mrf.mxu1 }
 0x276   :  { %v1237_v15 = vpop.f32.mrf.mxu1 }
 0x278   :  { %v1999_v53 = vpop.f32.mrf.mxu1 }
 0x279   :  { %v1473_v17 = vmul.f32 %v1999_v53, %v2514_v60  ;;  %v1470_v60 = vmul.f32 %v1237_v15, %v2937_v41  ;;  %v1742_v53 = vld [vmem:[%s2903_s2 + $0x2] ss:$0 sm:$0xff] }
 0x27a   :  { %v1247_v44 = vpop.f32.mrf.mxu1 }
 0x27e   :  { %v2002_v40 = vpop.f32.mrf.mxu1 }
 0x27f   :  { %v1475_v21 = vmul.f32 %v2002_v40, %v2940_v50  ;;  %v1471_v50 = vmul.f32 %v1996_v29, %v2500_v54  ;;  %v2948_v54 = vld [vmem:[#allocation12_spill] sm:$0xff] }
 0x280   :  { %v1257_v19 = vpop.f32.mrf.mxu1 }
 0x281   :  { %v1474_v22 = vmul.f32 %v1257_v19, %v2526_v12  ;;  %v1455_v12 = vmul.f32 %v1972_v4, %v2387_v35  ;;  %v2950_v4 = vld [vmem:[#allocation11_spill] sm:$0xff] }
 0x282   :  { %v2005_v38 = vpop.f32.mrf.mxu1 }
 0x283   :  { %v1477_v8 = vmul.f32 %v2005_v38, %v2938_v51  ;;  %v1458_v51 = vmul.f32 %v1177_v59, %v2398_v46 }
 0x284   :  { %v1267_v26 = vpop.f32.mrf.mxu1 }
 0x285   :  { %v1476_v34 = vmul.f32 %v1267_v26, %v2939_v16  ;;  %v1457_v16 = vmul.f32 %v1975_v20, %v2410_v62  ;;  %v1454_v62 = vmul.f32 %v2818_v25, %v2392_v42  ;;  %v1452_v42 = vmul.f32 %v2816_v11, %v2368_v5  ;;  %v2953_v20 = vld [vmem:[#allocation13_spill] sm:$0xff] }
 0x286   :  { %v2008_v31 = vpop.f32.mrf.mxu1  ;;  %v1450_v25 = vmul.f32 %v2812_v36, %v2950_v4  ;;  %v1465_v5 = vmul.f32 %v2820_v58, %v2457_v47  ;;  %v2957_v36 = vld [vmem:[#allocation14_spill] sm:$0xff]  ;;  %v2959_v47 = vld [vmem:[#allocation8_spill] sm:$0xff]  ;;  %v1565_v58 = vld [vmem:[%s2906_s5 + $0x10] sm:$0xff] }
 0x287   :  { %v1479_v1 = vmul.f32 %v2008_v31, %v2947_v56  ;;  %v1460_v31 = vmul.f32 %v1187_v55, %v2431_v18  ;;  %v1472_v18 = vmul.f32 %v1247_v44, %v2517_v45  ;;  %v2958_v55 = vld [vmem:[#allocation6_spill] sm:$0xff] }
 0x288   :  { %v1277_v39 = vpop.f32.mrf.mxu1 }
 0x289   :  { %v1478_v27 = vmul.f32 %v1277_v39, %v2356_v57  ;;  %1859 = vmatprep.subr.mxu1 %v1479_v1  ;;  %v1459_v57 = vmul.f32 %v1978_v6, %v2395_v43  ;;  %v2955_v6 = vld [vmem:[#allocation7_spill] sm:$0xff] }
 0x28a   :  { %1860 = vmatpush3.msra.mxu1 %v1463_v28  ;;  %v1453_v28 = vmul.f32 %v2814_v23, %v2948_v54 }
 0x28b   :  { %1861 = vmatprep.subr.mxu1 %v1478_v27 }
 0x28c   :  { %1862 = vmatpush3.msra.mxu1 %v1462_v63  ;;  %v2949_v63 = vld [vmem:[#allocation9_spill] sm:$0xff] }
 0x28d   :  { %1863 = vmatprep.subr.mxu1 %v1477_v8  ;;  %v1451_v23 = vmul.f32 %v2810_v32, %v2949_v63  ;;  %v2954_v32 = vld [vmem:[#allocation17_spill] sm:$0xff]  ;;  %v1564_v8 = vld [vmem:[%s2906_s5 + $0x8] sm:$0xff] }
 0x28e   :  { %1864 = vmatpush3.msra.mxu1 %v1461_v48  ;;  %v1456_v48 = vmul.f32 %v1167_v30, %v2413_v0  ;;  %v1469_v0 = vmul.f32 %v1993_v7, %v2481_v13  ;;  %v1467_v13 = vmul.f32 %v2824_v49, %v2465_v2  ;;  %v2951_v2 = vld [vmem:[#allocation5_spill] sm:$0xff]  ;;  %v1464_v30 = vmul.f32 %v2954_v32, %v2953_v20  ;;  %v1563_v49 = vld [vmem:[%s2906_s5] sm:$0xff] }
 0x28f   :  { %1865 = vmatprep.subr.mxu1 %v1476_v34  ;;  %v1468_v34 = vmul.f32 %v1227_v37, %v2484_v14  ;;  %v1466_v14 = vmul.f32 %v2826_v9, %v2468_v3  ;;  %v2956_v3 = vld [vmem:[#allocation16_spill] sm:$0xff] }
 0x290   :  { %1866 = vmatpush3.msra.mxu1 %v1460_v31  ;;  %v1448_v59 = vmul.f32 %v2956_v3, %v2955_v6 }
 0x291   :  { %1867 = vmatprep.subr.mxu1 %v1475_v21 }
 0x292   :  { %1868 = vmatpush3.msra.mxu1 %v1459_v57 }
 0x293   :  { %1869 = vmatprep.subr.mxu1 %v1474_v22 }
 0x294   :  { %1870 = vmatpush3.msra.mxu1 %v1458_v51  ;;  %v1743_v51 = vld [vmem:[%s2903_s2 + $0x3] ss:$0 sm:$0xff] }
 0x295   :  { %1871 = vmatprep.subr.mxu1 %v1473_v17 }
 0x296   :  { %1872 = vmatpush3.msra.mxu1 %v1457_v16  ;;  %v1814_v43 = vpop.f32.mrf.mxu0 }
 0x297   :  { %1873 = vmatprep.subr.mxu1 %v1472_v18 }
 0x298   :  { %1874 = vmatpush3.msra.mxu1 %v1456_v48  ;;  %v1815_v46 = vpop.f32.mrf.mxu0 }
 0x299   :  { %v1816_v27 = vadd.f32 %v1815_v46, %v1814_v43  ;;  %1875 = vmatprep.subr.mxu1 %v1471_v50 }
 0x29a   :  { %1876 = vmatpush3.msra.mxu1 %v1455_v12  ;;  %v1817_v45 = vpop.f32.mrf.mxu0 }
 0x29b   :  { %v981_v39 = vadd.f32 %v2796_v24, %v1816_v27  ;;  %1877 = vmatprep.subr.mxu1 %v1470_v60 }
 0x29c   :  { %1878 = vmatpush3.msra.mxu1 %v1454_v62  ;;  %v1818_v35 = vpop.f32.mrf.mxu0 }
 0x29d   :  { %2111 = vrcp.f32 %v981_v39  ;;  %v1819_v41 = vadd.f32 %v1818_v35, %v1817_v45  ;;  %1879 = vmatprep.subr.mxu1 %v1469_v0 }
 0x29e   :  { %1880 = vmatpush3.msra.mxu1 %v1453_v28  ;;  %v2013_v9 = vpop.f32.mrf.mxu0 }
 0x29f   :  { %v986_v24 = vadd.f32 %v2801_v61, %v1819_v41  ;;  %1881 = vmatprep.subr.mxu1 %v1468_v34  ;;  %v2952_v61 = vld [vmem:[#allocation15_spill] sm:$0xff]  ;;  %v1485_v26 = vmul.f32 %v2013_v9, %v1742_v53 }
 0x2a0   :  { %1882 = vmatpush3.msra.mxu1 %v1452_v42  ;;  %v1449_v11 = vmul.f32 %v2952_v61, %v2951_v2  ;;  %v1358_v37 = vpop.f32.mrf.mxu0 }
 0x2a1   :  { %2113 = vrcp.f32 %v986_v24  ;;  %1883 = vmatprep.subr.mxu1 %v1467_v13  ;;  %v1484_v40 = vmul.f32 %v1742_v53, %v1358_v37 }
 0x2a2   :  { %1884 = vmatpush3.msra.mxu1 %v1451_v23 }
 0x2a3   :  { %1885 = vmatprep.subr.mxu1 %v1466_v14 }
 0x2a4   :  { %1886 = vmatpush3.msra.mxu1 %v1450_v25 }
 0x2a5   :  { %1887 = vmatprep.subr.mxu1 %v1465_v5 }
 0x2a6   :  { %1888 = vmatpush3.msra.mxu1 %v1449_v11 }
 0x2a7   :  { %1889 = vmatprep.subr.mxu1 %v1464_v30 }
 0x2a8   :  { %1890 = vmatpush3.msra.mxu1 %v1448_v59 }
 0x2a9   :  { %1551 = vmatmul.mubr.f32.vlgmr.msra.gmra.mxu1 %v2957_v36 }
 0x2aa   :  { %v2112_v10 = vpop.eup %2111  ;;  %1555 = vmatprep.mubr.f32.mxu1 %v2958_v55 }
 0x2ab   :  { %2016 = vmatprep.mubr.msk.f32.mxu0 %vm992_vm10, %v2112_v10 }
 0x2ad   :  { %1556 = vmatmul.mubr.f32.gmra.mxu1 %v2959_v47 }
 0x2ae   :  { %v2114_v33 = vpop.eup %2113 }
 0x2af   :  { %2017 = vmatmul.mubr.msk.f32.vlgmr.msra.gmra.mxu0 %vm992_vm10, %v2114_v33 }
 0x2b0   :  { %2020 = vmatpush3.msra.mxu0 %v1566_v52 }
 0x2b1   :  { %2021 = vmatprep.subr.mxu0 %v1565_v58 }
 0x2b2   :  { %2022 = vmatpush3.msra.mxu0 %v1565_v58 }
 0x2b3   :  { %2023 = vmatprep.subr.mxu0 %v1564_v8 }
 0x2b4   :  { %2024 = vmatpush3.msra.mxu0 %v1564_v8 }
 0x2b5   :  { %2025 = vmatprep.subr.mxu0 %v1563_v49 }
 0x2b6   :  { %2026 = vmatpush3.msra.mxu0 %v1563_v49 }
 0x369   :  { %v1891_v7 = vpop.f32.mrf.mxu1 }
 0x36b   :  { %v1892_v29 = vpop.f32.mrf.mxu1 }
 0x36c   :  { %v1893_v15 = vadd.f32 %v1892_v29, %v1891_v7 }
 0x36d   :  { %v1894_v44 = vpop.f32.mrf.mxu1 }
 0x36e   :  { %v1553_v1 = vadd.f32 %v1893_v15, %v1484_v40 }
 0x36f   :  { %v1895_v19 = vpop.f32.mrf.mxu1  ;;  %v2018_v38 = vpop.f32.mrf.mxu0 }
 0x370   :  { %v1896_v56 = vadd.f32 %v1895_v19, %v1894_v44 }
 0x371   :  { %v1439_v31 = vpop.f32.mrf.mxu0 }
 0x372   :  { %v1558_v21 = vadd.f32 %v1896_v56, %v1485_v26  ;;  %v1561_v57 = vmul.f32 %v1553_v1, %v1439_v31 }
 0x374   :  { %v1562_v22 = vmul.f32 %v2018_v38, %v1558_v21  ;;  %2027 = vmatprep.mubr.msk.f32.mxu0 %vm68_vm0, %v1561_v57 }
 0x376   :  { %2028 = vmatmul.mubr.msk.f32.vlgmr.msra.gmra.mxu0 %vm68_vm0, %v1562_v22 }
 0x436   :  { %v2029_v17 = vpop.f32.mrf.mxu0 }
 0x437   :  { %v1649_v16 = vadd.f32 %v2029_v17, %v1743_v51 }
 0x438   :  { %v1643_v18 = vpop.f32.mrf.mxu0 }
 0x439   :  { %1653 = vst [vmem:[#allocation2 + $0x8] sm:$0xff] %v1649_v16  ;;  %v1644_v48 = vadd.f32 %v1743_v51, %v1643_v18 }
 0x43b   :  { %1652 = vst [vmem:[#allocation2] sm:$0xff] %v1644_v48 }
 0x43c   :  { %2129 = shalt.err (!%p2126_p4)
}
 0x43d   :  { %s2143_s23 = smov 128   ;;  %s2144_s24 = smov 8  }
 0x43e   :  { %1665 = dma.vmem_to_hbm [thread:$0]  %s1660_s22, 256, %s2907_s6, [#allocation3], %s2143_s23, %s2143_s23, %s2144_s24  }
 0x43f   :  { %2138 = dma.done.wait [#allocation3], 256  }
 0x440   :  { %2139 = vsyncadd [#allocation3], 4294967040 }
 0x441   :  { %1669 = vsyncpa [#allocation3], 1 }

</bundles_post_ra>
